<compile_context>
chip_gen: v7x
topology: tpu7x:2x2x1
jax: 0.10.0
libtpu: 0.0.40
codegen_flags: <defaults>
</compile_context>

<pallas_src>
import jax
import jax.numpy as jnp
from jax.experimental import pallas as pl

# Model hyper-parameters (small, consistent with the module's constructor).
D_MODEL = 32
N_HEADS = 4
HEAD_DIM = D_MODEL // N_HEADS
DIM_FF = 64
LN_EPS = 1e-6


# ------------------------------- the kernel ---------------------------------
def decoder_layer_kernel(tgt_ref, enc_ref, ln_ref, attn_w_ref, attn_b_ref,
                         w1_ref, b1_ref, w2_ref, b2_ref, out_ref):
    B, S, D = tgt_ref.shape
    R = B * S

    x = tgt_ref[...].reshape(R, D)        # (B*S, D), batch-major rows
    enc = enc_ref[...].reshape(R, D)
    ln = ln_ref[...]                      # (6, D)

    def layer_norm(z, g, b):
        # PyTorch LayerNorm: biased variance, eps inside the sqrt.
        mu = jnp.mean(z, axis=-1, keepdims=True)
        zc = z - mu
        var = jnp.mean(zc * zc, axis=-1, keepdims=True)
        return zc * jax.lax.rsqrt(var + LN_EPS) * g + b

    # NOTE: the torch code scales by d_model ** 0.5 (not head_dim ** 0.5) -- reproduced.
    scale = 1.0 / (D_MODEL ** 0.5)

    def mha(q_src, kv_src, w, b, *, self_attn):
        # w: (D, 4D) = [Wq | Wk | Wv | Wo], b: (1, 4D)
        if self_attn:
            # fused QKV projection: one (R, D) x (D, 3D) matmul
            qkv = jnp.dot(q_src, w[:, :3 * D],
                          preferred_element_type=jnp.float32) + b[:, :3 * D]
            q, k, v = qkv[:, :D], qkv[:, D:2 * D], qkv[:, 2 * D:3 * D]
        else:
            # Q from the decoder stream, fused K|V from the encoder stream
            q = jnp.dot(q_src, w[:, :D],
                        preferred_element_type=jnp.float32) + b[:, :D]
            kv = jnp.dot(kv_src, w[:, D:3 * D],
                         preferred_element_type=jnp.float32) + b[:, D:3 * D]
            k, v = kv[:, :D], kv[:, D:2 * D]

        q3 = q.reshape(B, S, D)
        k3 = k.reshape(B, S, D)
        v3 = v.reshape(B, S, D)

        heads = []
        for h in range(N_HEADS):          # static loop; each einsum is batched over B
            sl = slice(h * HEAD_DIM, (h + 1) * HEAD_DIM)
            qh, kh, vh = q3[:, :, sl], k3[:, :, sl], v3[:, :, sl]     # (B, S, hd)
            s = jnp.einsum('bqd,bkd->bqk', qh, kh,
                           preferred_element_type=jnp.float32) * scale
            m = jnp.max(s, axis=-1, keepdims=True)
            p = jnp.exp(s - m)
            denom = jnp.sum(p, axis=-1, keepdims=True)
            p = p * pl.reciprocal(denom, approx=True)                 # EUP slot, free-ish
            o = jnp.einsum('bqk,bkd->bqd', p, vh,
                           preferred_element_type=jnp.float32)
            heads.append(o.reshape(R, HEAD_DIM))
        concat = jnp.concatenate(heads, axis=-1)                      # (R, D)
        return jnp.dot(concat, w[:, 3 * D:],
                       preferred_element_type=jnp.float32) + b[:, 3 * D:]

    # 1) pre-norm self-attention + residual (dropout == identity, eval semantics)
    h = layer_norm(x, ln[0:1], ln[1:2])
    x1 = x + mha(h, h, attn_w_ref[0], attn_b_ref[0], self_attn=True)

    # 2) pre-norm cross-attention over encoder output + residual
    h = layer_norm(x1, ln[2:3], ln[3:4])
    x2 = x1 + mha(h, enc, attn_w_ref[1], attn_b_ref[1], self_attn=False)

    # 3) pre-norm feed-forward (ReLU) + residual
    h = layer_norm(x2, ln[4:5], ln[5:6])
    h = jnp.maximum(jnp.dot(h, w1_ref[...],
                            preferred_element_type=jnp.float32) + b1_ref[...], 0.0)
    h = jnp.dot(h, w2_ref[...], preferred_element_type=jnp.float32) + b2_ref[...]

    out_ref[...] = (x2 + h).reshape(B, S, D)
    # TODO(synk): d_mask / e_mask support omitted (the forward's defaults are None).
    # TODO(synk): at production shapes, add a 'parallel' row-axis grid so both v7x
    #             TensorCores get work and re-budget VMEM (vmem_limit_bytes) for 64 MiB.


# ------------------------------ host wrapper ---------------------------------
def transformer_decoder_layer(tgt, enc, packed_params):
    B, S, D = tgt.shape
    # Single invocation: everything (a few KiB) fits in VMEM, so no grid at all.
    # Whole arrays are mapped into VMEM as full blocks by default.
    return pl.pallas_call(
        decoder_layer_kernel,
        out_shape=jax.ShapeDtypeStruct((B, S, D), jnp.float32),
    )(tgt, enc, *packed_params)


# -------------------------- deterministic params ------------------------------
def make_raw_params(key):
    keys = jax.random.split(key, 26)
    it = iter(keys)

    def lin(kin, kout):
        w = jax.random.normal(next(it), (kin, kout), jnp.float32) * 0.05
        b = jax.random.normal(next(it), (1, kout), jnp.float32) * 0.05
        return w, b

    def ln_p():
        g = 1.0 + 0.1 * jax.random.normal(next(it), (D_MODEL,), jnp.float32)
        b = 0.1 * jax.random.normal(next(it), (D_MODEL,), jnp.float32)
        return g, b

    raw = {}
    raw['mha_g'], raw['mha_b'] = ln_p()
    raw['ca_g'], raw['ca_b'] = ln_p()
    raw['ff_g'], raw['ff_b'] = ln_p()
    for name in ('sa', 'ca'):
        a = {}
        a['wq'], a['bq'] = lin(D_MODEL, D_MODEL)
        a['wk'], a['bk'] = lin(D_MODEL, D_MODEL)
        a['wv'], a['bv'] = lin(D_MODEL, D_MODEL)
        a['wo'], a['bo'] = lin(D_MODEL, D_MODEL)
        raw[name] = a
    raw['w1'], raw['b1'] = lin(D_MODEL, DIM_FF)
    raw['w2'], raw['b2'] = lin(DIM_FF, D_MODEL)
    return raw


def pack_params(raw):
    ln_pack = jnp.stack([raw['mha_g'], raw['mha_b'],
                         raw['ca_g'], raw['ca_b'],
                         raw['ff_g'], raw['ff_b']], axis=0)               # (6, D)

    def pack_attn(a):
        w = jnp.concatenate([a['wq'], a['wk'], a['wv'], a['wo']], axis=1)  # (D, 4D)
        b = jnp.concatenate([a['bq'], a['bk'], a['bv'], a['bo']], axis=1)  # (1, 4D)
        return w, b

    w_sa, b_sa = pack_attn(raw['sa'])
    w_ca, b_ca = pack_attn(raw['ca'])
    attn_w = jnp.stack([w_sa, w_ca], axis=0)                               # (2, D, 4D)
    attn_b = jnp.stack([b_sa, b_ca], axis=0)                               # (2, 1, 4D)
    return [ln_pack, attn_w, attn_b, raw['w1'], raw['b1'], raw['w2'], raw['b2']]


# ---------------------------- pure-JAX reference ------------------------------
def reference(tgt, enc, raw):
    def layer_norm(z, g, b):
        mu = jnp.mean(z, axis=-1, keepdims=True)
        zc = z - mu
        var = jnp.mean(zc * zc, axis=-1, keepdims=True)
        return zc * jax.lax.rsqrt(var + LN_EPS) * g + b

    def mha(q_in, k_in, v_in, a):
        B, S, _ = q_in.shape
        q = q_in @ a['wq'] + a['bq']
        k = k_in @ a['wk'] + a['bk']
        v = v_in @ a['wv'] + a['bv']

        def split(t):
            return t.reshape(B, S, N_HEADS, HEAD_DIM).transpose(0, 2, 1, 3)

        qh, kh, vh = split(q), split(k), split(v)
        scores = jnp.einsum('bhqd,bhkd->bhqk', qh, kh) / (D_MODEL ** 0.5)
        p = jax.nn.softmax(scores, axis=-1)
        o = jnp.einsum('bhqk,bhkd->bhqd', p, vh)
        o = o.transpose(0, 2, 1, 3).reshape(B, S, D_MODEL)
        return o @ a['wo'] + a['bo']

    x = tgt
    h = layer_norm(x, raw['mha_g'], raw['mha_b'])
    x1 = x + mha(h, h, h, raw['sa'])
    h = layer_norm(x1, raw['ca_g'], raw['ca_b'])
    x2 = x1 + mha(h, enc, enc, raw['ca'])
    h = layer_norm(x2, raw['ff_g'], raw['ff_b'])
    h = jnp.maximum(h @ raw['w1'] + raw['b1'], 0.0) @ raw['w2'] + raw['b2']
    return x2 + h


if __name__ == "__main__":
    B, S = 2, 8
    key = jax.random.PRNGKey(0)
    k_tgt, k_enc, k_par = jax.random.split(key, 3)
    tgt = jax.random.normal(k_tgt, (B, S, D_MODEL), jnp.float32)
    enc = jax.random.normal(k_enc, (B, S, D_MODEL), jnp.float32)

    raw = make_raw_params(k_par)
    packed = pack_params(raw)

    out = transformer_decoder_layer(tgt, enc, packed)
    out = jax.block_until_ready(out)

    ref = reference(tgt, enc, raw)
    assert out.shape == (B, S, D_MODEL)
    max_err = jnp.max(jnp.abs(out - ref))
    assert jnp.allclose(out, ref, atol=1e-3, rtol=1e-3), f"mismatch vs reference (max err {max_err})"
    print("KERNEL_OK")
</pallas_src>

<mosaic_0001>
module attributes {stable_mosaic.version = 11 : i64} {
  func.func @decoder_layer_kernel(%arg0: memref<2x8x32xf32, #tpu.memory_space<vmem>>, %arg1: memref<2x8x32xf32, #tpu.memory_space<vmem>>, %arg2: memref<6x32xf32, #tpu.memory_space<vmem>>, %arg3: memref<2x32x128xf32, #tpu.memory_space<vmem>>, %arg4: memref<2x1x128xf32, #tpu.memory_space<vmem>>, %arg5: memref<32x64xf32, #tpu.memory_space<vmem>>, %arg6: memref<1x64xf32, #tpu.memory_space<vmem>>, %arg7: memref<64x32xf32, #tpu.memory_space<vmem>>, %arg8: memref<1x32xf32, #tpu.memory_space<vmem>>, %arg9: memref<2x8x32xf32, #tpu.memory_space<vmem>>) attributes {dimension_semantics = [], scalar_prefetch = 0 : i64, scratch_operands = 0 : i64, tpu.core_type = #tpu.core_type<tc>} {
    %c0 = arith.constant 0 : index
    %c0_0 = arith.constant 0 : index
    %c0_1 = arith.constant 0 : index
    %0 = vector.load %arg0[%c0, %c0_0, %c0_1] : memref<2x8x32xf32, #tpu.memory_space<vmem>>, vector<2x8x32xf32>
    %1 = vector.shape_cast %0 : vector<2x8x32xf32> to vector<16x32xf32>
    %c0_2 = arith.constant 0 : index
    %c0_3 = arith.constant 0 : index
    %c0_4 = arith.constant 0 : index
    %2 = vector.load %arg1[%c0_2, %c0_3, %c0_4] : memref<2x8x32xf32, #tpu.memory_space<vmem>>, vector<2x8x32xf32>
    %3 = vector.shape_cast %2 : vector<2x8x32xf32> to vector<16x32xf32>
    %c0_5 = arith.constant 0 : index
    %c0_6 = arith.constant 0 : index
    %4 = vector.load %arg2[%c0_5, %c0_6] : memref<6x32xf32, #tpu.memory_space<vmem>>, vector<6x32xf32>
    %5 = vector.extract_strided_slice %4 {offsets = [0, 0], sizes = [1, 32], strides = [1, 1]} : vector<6x32xf32> to vector<1x32xf32>
    %6 = vector.extract_strided_slice %4 {offsets = [1, 0], sizes = [1, 32], strides = [1, 1]} : vector<6x32xf32> to vector<1x32xf32>
    %cst = arith.constant dense<0.000000e+00> : vector<16xf32>
    %7 = vector.multi_reduction <add>, %1, %cst [1] : vector<16x32xf32> to vector<16xf32>
    %8 = vector.shape_cast %7 : vector<16xf32> to vector<16x1xf32>
    %cst_7 = arith.constant 3.200000e+01 : f32
    %9 = vector.broadcast %cst_7 : f32 to vector<16x1xf32>
    %10 = arith.divf %8, %9 : vector<16x1xf32>
    %11 = vector.broadcast %10 : vector<16x1xf32> to vector<16x32xf32>
    %12 = arith.subf %1, %11 : vector<16x32xf32>
    %13 = arith.mulf %12, %12 : vector<16x32xf32>
    %cst_8 = arith.constant dense<0.000000e+00> : vector<16xf32>
    %14 = vector.multi_reduction <add>, %13, %cst_8 [1] : vector<16x32xf32> to vector<16xf32>
    %15 = vector.shape_cast %14 : vector<16xf32> to vector<16x1xf32>
    %cst_9 = arith.constant 3.200000e+01 : f32
    %16 = vector.broadcast %cst_9 : f32 to vector<16x1xf32>
    %17 = arith.divf %15, %16 : vector<16x1xf32>
    %cst_10 = arith.constant 9.99999997E-7 : f32
    %18 = vector.broadcast %cst_10 : f32 to vector<16x1xf32>
    %19 = arith.addf %17, %18 : vector<16x1xf32>
    %20 = math.rsqrt %19 : vector<16x1xf32>
    %21 = vector.broadcast %20 : vector<16x1xf32> to vector<16x32xf32>
    %22 = arith.mulf %12, %21 : vector<16x32xf32>
    %23 = vector.broadcast %5 : vector<1x32xf32> to vector<16x32xf32>
    %24 = arith.mulf %22, %23 : vector<16x32xf32>
    %25 = vector.broadcast %6 : vector<1x32xf32> to vector<16x32xf32>
    %26 = arith.addf %24, %25 : vector<16x32xf32>
    %c0_11 = arith.constant 0 : index
    %c0_12 = arith.constant 0 : index
    %c0_13 = arith.constant 0 : index
    %27 = vector.load %arg3[%c0_11, %c0_12, %c0_13] : memref<2x32x128xf32, #tpu.memory_space<vmem>>, vector<1x32x128xf32>
    %28 = vector.shape_cast %27 : vector<1x32x128xf32> to vector<32x128xf32>
    %c0_14 = arith.constant 0 : index
    %c0_15 = arith.constant 0 : index
    %c0_16 = arith.constant 0 : index
    %29 = vector.load %arg4[%c0_14, %c0_15, %c0_16] : memref<2x1x128xf32, #tpu.memory_space<vmem>>, vector<1x1x128xf32>
    %30 = vector.shape_cast %29 : vector<1x1x128xf32> to vector<1x128xf32>
    %31 = vector.extract_strided_slice %28 {offsets = [0, 0], sizes = [32, 96], strides = [1, 1]} : vector<32x128xf32> to vector<32x96xf32>
    %cst_17 = arith.constant dense<0.000000e+00> : vector<16x96xf32>
    %32 = tpu.matmul %26, %31, %cst_17 {dimension_numbers = #tpu.dot_dimension_numbers<[1], [0], [0], [1], [0, 0, 1, 1], [], []>} : vector<16x32xf32>, vector<32x96xf32>, vector<16x96xf32> -> vector<16x96xf32>
    %33 = vector.extract_strided_slice %30 {offsets = [0, 0], sizes = [1, 96], strides = [1, 1]} : vector<1x128xf32> to vector<1x96xf32>
    %34 = vector.broadcast %33 : vector<1x96xf32> to vector<16x96xf32>
    %35 = arith.addf %32, %34 : vector<16x96xf32>
    %36 = vector.extract_strided_slice %35 {offsets = [0, 0], sizes = [16, 32], strides = [1, 1]} : vector<16x96xf32> to vector<16x32xf32>
    %37 = vector.extract_strided_slice %35 {offsets = [0, 32], sizes = [16, 32], strides = [1, 1]} : vector<16x96xf32> to vector<16x32xf32>
    %38 = vector.extract_strided_slice %35 {offsets = [0, 64], sizes = [16, 32], strides = [1, 1]} : vector<16x96xf32> to vector<16x32xf32>
    %39 = vector.shape_cast %36 : vector<16x32xf32> to vector<2x8x32xf32>
    %40 = vector.shape_cast %37 : vector<16x32xf32> to vector<2x8x32xf32>
    %41 = vector.shape_cast %38 : vector<16x32xf32> to vector<2x8x32xf32>
    %42 = vector.extract_strided_slice %39 {offsets = [0, 0, 0], sizes = [2, 8, 8], strides = [1, 1, 1]} : vector<2x8x32xf32> to vector<2x8x8xf32>
    %43 = vector.extract_strided_slice %40 {offsets = [0, 0, 0], sizes = [2, 8, 8], strides = [1, 1, 1]} : vector<2x8x32xf32> to vector<2x8x8xf32>
    %44 = vector.extract_strided_slice %41 {offsets = [0, 0, 0], sizes = [2, 8, 8], strides = [1, 1, 1]} : vector<2x8x32xf32> to vector<2x8x8xf32>
    "tpu.trace_start"() <{level = 10 : i32, message = "bqd,bkd->bqk"}> : () -> ()
    %cst_18 = arith.constant dense<0.000000e+00> : vector<2x8x8xf32>
    %45 = tpu.matmul %42, %43, %cst_18 {dimension_numbers = #tpu.dot_dimension_numbers<[2], [2], [1], [1], [0, 0, 0, 1, 1, 1], [0], [0]>} : vector<2x8x8xf32>, vector<2x8x8xf32>, vector<2x8x8xf32> -> vector<2x8x8xf32>
    "tpu.trace_stop"() : () -> ()
    %cst_19 = arith.constant 0.176776692 : f32
    %46 = vector.broadcast %cst_19 : f32 to vector<2x8x8xf32>
    %47 = arith.mulf %45, %46 : vector<2x8x8xf32>
    %cst_20 = arith.constant dense<0xFF800000> : vector<2x8xf32>
    %48 = vector.multi_reduction <maximumf>, %47, %cst_20 [2] : vector<2x8x8xf32> to vector<2x8xf32>
    %49 = vector.shape_cast %48 : vector<2x8xf32> to vector<2x8x1xf32>
    %50 = vector.broadcast %49 : vector<2x8x1xf32> to vector<2x8x8xf32>
    %51 = arith.subf %47, %50 : vector<2x8x8xf32>
    %52 = math.exp %51 : vector<2x8x8xf32>
    %cst_21 = arith.constant dense<0.000000e+00> : vector<2x8xf32>
    %53 = vector.multi_reduction <add>, %52, %cst_21 [2] : vector<2x8x8xf32> to vector<2x8xf32>
    %54 = vector.shape_cast %53 : vector<2x8xf32> to vector<2x8x1xf32>
    %55 = tpu.reciprocal %54 {approx = true} : vector<2x8x1xf32> -> vector<2x8x1xf32>
    %56 = vector.broadcast %55 : vector<2x8x1xf32> to vector<2x8x8xf32>
    %57 = arith.mulf %52, %56 : vector<2x8x8xf32>
    "tpu.trace_start"() <{level = 10 : i32, message = "bqk,bkd->bqd"}> : () -> ()
    %cst_22 = arith.constant dense<0.000000e+00> : vector<2x8x8xf32>
    %58 = tpu.matmul %57, %44, %cst_22 {dimension_numbers = #tpu.dot_dimension_numbers<[2], [1], [1], [2], [0, 0, 0, 1, 1, 2], [0], [0]>} : vector<2x8x8xf32>, vector<2x8x8xf32>, vector<2x8x8xf32> -> vector<2x8x8xf32>
    "tpu.trace_stop"() : () -> ()
    %59 = vector.shape_cast %58 : vector<2x8x8xf32> to vector<16x8xf32>
    %60 = vector.extract_strided_slice %39 {offsets = [0, 0, 8], sizes = [2, 8, 8], strides = [1, 1, 1]} : vector<2x8x32xf32> to vector<2x8x8xf32>
    %61 = vector.extract_strided_slice %40 {offsets = [0, 0, 8], sizes = [2, 8, 8], strides = [1, 1, 1]} : vector<2x8x32xf32> to vector<2x8x8xf32>
    %62 = vector.extract_strided_slice %41 {offsets = [0, 0, 8], sizes = [2, 8, 8], strides = [1, 1, 1]} : vector<2x8x32xf32> to vector<2x8x8xf32>
    "tpu.trace_start"() <{level = 10 : i32, message = "bqd,bkd->bqk"}> : () -> ()
    %cst_23 = arith.constant dense<0.000000e+00> : vector<2x8x8xf32>
    %63 = tpu.matmul %60, %61, %cst_23 {dimension_numbers = #tpu.dot_dimension_numbers<[2], [2], [1], [1], [0, 0, 0, 1, 1, 1], [0], [0]>} : vector<2x8x8xf32>, vector<2x8x8xf32>, vector<2x8x8xf32> -> vector<2x8x8xf32>
    "tpu.trace_stop"() : () -> ()
    %cst_24 = arith.constant 0.176776692 : f32
    %64 = vector.broadcast %cst_24 : f32 to vector<2x8x8xf32>
    %65 = arith.mulf %63, %64 : vector<2x8x8xf32>
    %cst_25 = arith.constant dense<0xFF800000> : vector<2x8xf32>
    %66 = vector.multi_reduction <maximumf>, %65, %cst_25 [2] : vector<2x8x8xf32> to vector<2x8xf32>
    %67 = vector.shape_cast %66 : vector<2x8xf32> to vector<2x8x1xf32>
    %68 = vector.broadcast %67 : vector<2x8x1xf32> to vector<2x8x8xf32>
    %69 = arith.subf %65, %68 : vector<2x8x8xf32>
    %70 = math.exp %69 : vector<2x8x8xf32>
    %cst_26 = arith.constant dense<0.000000e+00> : vector<2x8xf32>
    %71 = vector.multi_reduction <add>, %70, %cst_26 [2] : vector<2x8x8xf32> to vector<2x8xf32>
    %72 = vector.shape_cast %71 : vector<2x8xf32> to vector<2x8x1xf32>
    %73 = tpu.reciprocal %72 {approx = true} : vector<2x8x1xf32> -> vector<2x8x1xf32>
    %74 = vector.broadcast %73 : vector<2x8x1xf32> to vector<2x8x8xf32>
    %75 = arith.mulf %70, %74 : vector<2x8x8xf32>
    "tpu.trace_start"() <{level = 10 : i32, message = "bqk,bkd->bqd"}> : () -> ()
    %cst_27 = arith.constant dense<0.000000e+00> : vector<2x8x8xf32>
    %76 = tpu.matmul %75, %62, %cst_27 {dimension_numbers = #tpu.dot_dimension_numbers<[2], [1], [1], [2], [0, 0, 0, 1, 1, 2], [0], [0]>} : vector<2x8x8xf32>, vector<2x8x8xf32>, vector<2x8x8xf32> -> vector<2x8x8xf32>
    "tpu.trace_stop"() : () -> ()
    %77 = vector.shape_cast %76 : vector<2x8x8xf32> to vector<16x8xf32>
    %78 = vector.extract_strided_slice %39 {offsets = [0, 0, 16], sizes = [2, 8, 8], strides = [1, 1, 1]} : vector<2x8x32xf32> to vector<2x8x8xf32>
    %79 = vector.extract_strided_slice %40 {offsets = [0, 0, 16], sizes = [2, 8, 8], strides = [1, 1, 1]} : vector<2x8x32xf32> to vector<2x8x8xf32>
    %80 = vector.extract_strided_slice %41 {offsets = [0, 0, 16], sizes = [2, 8, 8], strides = [1, 1, 1]} : vector<2x8x32xf32> to vector<2x8x8xf32>
    "tpu.trace_start"() <{level = 10 : i32, message = "bqd,bkd->bqk"}> : () -> ()
    %cst_28 = arith.constant dense<0.000000e+00> : vector<2x8x8xf32>
    %81 = tpu.matmul %78, %79, %cst_28 {dimension_numbers = #tpu.dot_dimension_numbers<[2], [2], [1], [1], [0, 0, 0, 1, 1, 1], [0], [0]>} : vector<2x8x8xf32>, vector<2x8x8xf32>, vector<2x8x8xf32> -> vector<2x8x8xf32>
    "tpu.trace_stop"() : () -> ()
    %cst_29 = arith.constant 0.176776692 : f32
    %82 = vector.broadcast %cst_29 : f32 to vector<2x8x8xf32>
    %83 = arith.mulf %81, %82 : vector<2x8x8xf32>
    %cst_30 = arith.constant dense<0xFF800000> : vector<2x8xf32>
    %84 = vector.multi_reduction <maximumf>, %83, %cst_30 [2] : vector<2x8x8xf32> to vector<2x8xf32>
    %85 = vector.shape_cast %84 : vector<2x8xf32> to vector<2x8x1xf32>
    %86 = vector.broadcast %85 : vector<2x8x1xf32> to vector<2x8x8xf32>
    %87 = arith.subf %83, %86 : vector<2x8x8xf32>
    %88 = math.exp %87 : vector<2x8x8xf32>
    %cst_31 = arith.constant dense<0.000000e+00> : vector<2x8xf32>
    %89 = vector.multi_reduction <add>, %88, %cst_31 [2] : vector<2x8x8xf32> to vector<2x8xf32>
    %90 = vector.shape_cast %89 : vector<2x8xf32> to vector<2x8x1xf32>
    %91 = tpu.reciprocal %90 {approx = true} : vector<2x8x1xf32> -> vector<2x8x1xf32>
    %92 = vector.broadcast %91 : vector<2x8x1xf32> to vector<2x8x8xf32>
    %93 = arith.mulf %88, %92 : vector<2x8x8xf32>
    "tpu.trace_start"() <{level = 10 : i32, message = "bqk,bkd->bqd"}> : () -> ()
    %cst_32 = arith.constant dense<0.000000e+00> : vector<2x8x8xf32>
    %94 = tpu.matmul %93, %80, %cst_32 {dimension_numbers = #tpu.dot_dimension_numbers<[2], [1], [1], [2], [0, 0, 0, 1, 1, 2], [0], [0]>} : vector<2x8x8xf32>, vector<2x8x8xf32>, vector<2x8x8xf32> -> vector<2x8x8xf32>
    "tpu.trace_stop"() : () -> ()
    %95 = vector.shape_cast %94 : vector<2x8x8xf32> to vector<16x8xf32>
    %96 = vector.extract_strided_slice %39 {offsets = [0, 0, 24], sizes = [2, 8, 8], strides = [1, 1, 1]} : vector<2x8x32xf32> to vector<2x8x8xf32>
    %97 = vector.extract_strided_slice %40 {offsets = [0, 0, 24], sizes = [2, 8, 8], strides = [1, 1, 1]} : vector<2x8x32xf32> to vector<2x8x8xf32>
    %98 = vector.extract_strided_slice %41 {offsets = [0, 0, 24], sizes = [2, 8, 8], strides = [1, 1, 1]} : vector<2x8x32xf32> to vector<2x8x8xf32>
    "tpu.trace_start"() <{level = 10 : i32, message = "bqd,bkd->bqk"}> : () -> ()
    %cst_33 = arith.constant dense<0.000000e+00> : vector<2x8x8xf32>
    %99 = tpu.matmul %96, %97, %cst_33 {dimension_numbers = #tpu.dot_dimension_numbers<[2], [2], [1], [1], [0, 0, 0, 1, 1, 1], [0], [0]>} : vector<2x8x8xf32>, vector<2x8x8xf32>, vector<2x8x8xf32> -> vector<2x8x8xf32>
    "tpu.trace_stop"() : () -> ()
    %cst_34 = arith.constant 0.176776692 : f32
    %100 = vector.broadcast %cst_34 : f32 to vector<2x8x8xf32>
    %101 = arith.mulf %99, %100 : vector<2x8x8xf32>
    %cst_35 = arith.constant dense<0xFF800000> : vector<2x8xf32>
    %102 = vector.multi_reduction <maximumf>, %101, %cst_35 [2] : vector<2x8x8xf32> to vector<2x8xf32>
    %103 = vector.shape_cast %102 : vector<2x8xf32> to vector<2x8x1xf32>
    %104 = vector.broadcast %103 : vector<2x8x1xf32> to vector<2x8x8xf32>
    %105 = arith.subf %101, %104 : vector<2x8x8xf32>
    %106 = math.exp %105 : vector<2x8x8xf32>
    %cst_36 = arith.constant dense<0.000000e+00> : vector<2x8xf32>
    %107 = vector.multi_reduction <add>, %106, %cst_36 [2] : vector<2x8x8xf32> to vector<2x8xf32>
    %108 = vector.shape_cast %107 : vector<2x8xf32> to vector<2x8x1xf32>
    %109 = tpu.reciprocal %108 {approx = true} : vector<2x8x1xf32> -> vector<2x8x1xf32>
    %110 = vector.broadcast %109 : vector<2x8x1xf32> to vector<2x8x8xf32>
    %111 = arith.mulf %106, %110 : vector<2x8x8xf32>
    "tpu.trace_start"() <{level = 10 : i32, message = "bqk,bkd->bqd"}> : () -> ()
    %cst_37 = arith.constant dense<0.000000e+00> : vector<2x8x8xf32>
    %112 = tpu.matmul %111, %98, %cst_37 {dimension_numbers = #tpu.dot_dimension_numbers<[2], [1], [1], [2], [0, 0, 0, 1, 1, 2], [0], [0]>} : vector<2x8x8xf32>, vector<2x8x8xf32>, vector<2x8x8xf32> -> vector<2x8x8xf32>
    "tpu.trace_stop"() : () -> ()
    %113 = vector.shape_cast %112 : vector<2x8x8xf32> to vector<16x8xf32>
    %114 = tpu.concatenate %59, %77, %95, %113 in 1 : vector<16x8xf32>, vector<16x8xf32>, vector<16x8xf32>, vector<16x8xf32> -> vector<16x32xf32>
    %115 = vector.extract_strided_slice %28 {offsets = [0, 96], sizes = [32, 32], strides = [1, 1]} : vector<32x128xf32> to vector<32x32xf32>
    %cst_38 = arith.constant dense<0.000000e+00> : vector<16x32xf32>
    %116 = tpu.matmul %114, %115, %cst_38 {dimension_numbers = #tpu.dot_dimension_numbers<[1], [0], [0], [1], [0, 0, 1, 1], [], []>} : vector<16x32xf32>, vector<32x32xf32>, vector<16x32xf32> -> vector<16x32xf32>
    %117 = vector.extract_strided_slice %30 {offsets = [0, 96], sizes = [1, 32], strides = [1, 1]} : vector<1x128xf32> to vector<1x32xf32>
    %118 = vector.broadcast %117 : vector<1x32xf32> to vector<16x32xf32>
    %119 = arith.addf %116, %118 : vector<16x32xf32>
    %120 = arith.addf %1, %119 : vector<16x32xf32>
    %121 = vector.extract_strided_slice %4 {offsets = [2, 0], sizes = [1, 32], strides = [1, 1]} : vector<6x32xf32> to vector<1x32xf32>
    %122 = vector.extract_strided_slice %4 {offsets = [3, 0], sizes = [1, 32], strides = [1, 1]} : vector<6x32xf32> to vector<1x32xf32>
    %cst_39 = arith.constant dense<0.000000e+00> : vector<16xf32>
    %123 = vector.multi_reduction <add>, %120, %cst_39 [1] : vector<16x32xf32> to vector<16xf32>
    %124 = vector.shape_cast %123 : vector<16xf32> to vector<16x1xf32>
    %cst_40 = arith.constant 3.200000e+01 : f32
    %125 = vector.broadcast %cst_40 : f32 to vector<16x1xf32>
    %126 = arith.divf %124, %125 : vector<16x1xf32>
    %127 = vector.broadcast %126 : vector<16x1xf32> to vector<16x32xf32>
    %128 = arith.subf %120, %127 : vector<16x32xf32>
    %129 = arith.mulf %128, %128 : vector<16x32xf32>
    %cst_41 = arith.constant dense<0.000000e+00> : vector<16xf32>
    %130 = vector.multi_reduction <add>, %129, %cst_41 [1] : vector<16x32xf32> to vector<16xf32>
    %131 = vector.shape_cast %130 : vector<16xf32> to vector<16x1xf32>
    %cst_42 = arith.constant 3.200000e+01 : f32
    %132 = vector.broadcast %cst_42 : f32 to vector<16x1xf32>
    %133 = arith.divf %131, %132 : vector<16x1xf32>
    %cst_43 = arith.constant 9.99999997E-7 : f32
    %134 = vector.broadcast %cst_43 : f32 to vector<16x1xf32>
    %135 = arith.addf %133, %134 : vector<16x1xf32>
    %136 = math.rsqrt %135 : vector<16x1xf32>
    %137 = vector.broadcast %136 : vector<16x1xf32> to vector<16x32xf32>
    %138 = arith.mulf %128, %137 : vector<16x32xf32>
    %139 = vector.broadcast %121 : vector<1x32xf32> to vector<16x32xf32>
    %140 = arith.mulf %138, %139 : vector<16x32xf32>
    %141 = vector.broadcast %122 : vector<1x32xf32> to vector<16x32xf32>
    %142 = arith.addf %140, %141 : vector<16x32xf32>
    %c1 = arith.constant 1 : index
    %c0_44 = arith.constant 0 : index
    %c0_45 = arith.constant 0 : index
    %143 = vector.load %arg3[%c1, %c0_44, %c0_45] : memref<2x32x128xf32, #tpu.memory_space<vmem>>, vector<1x32x128xf32>
    %144 = vector.shape_cast %143 : vector<1x32x128xf32> to vector<32x128xf32>
    %c1_46 = arith.constant 1 : index
    %c0_47 = arith.constant 0 : index
    %c0_48 = arith.constant 0 : index
    %145 = vector.load %arg4[%c1_46, %c0_47, %c0_48] : memref<2x1x128xf32, #tpu.memory_space<vmem>>, vector<1x1x128xf32>
    %146 = vector.shape_cast %145 : vector<1x1x128xf32> to vector<1x128xf32>
    %147 = vector.extract_strided_slice %144 {offsets = [0, 0], sizes = [32, 32], strides = [1, 1]} : vector<32x128xf32> to vector<32x32xf32>
    %cst_49 = arith.constant dense<0.000000e+00> : vector<16x32xf32>
    %148 = tpu.matmul %142, %147, %cst_49 {dimension_numbers = #tpu.dot_dimension_numbers<[1], [0], [0], [1], [0, 0, 1, 1], [], []>} : vector<16x32xf32>, vector<32x32xf32>, vector<16x32xf32> -> vector<16x32xf32>
    %149 = vector.extract_strided_slice %146 {offsets = [0, 0], sizes = [1, 32], strides = [1, 1]} : vector<1x128xf32> to vector<1x32xf32>
    %150 = vector.broadcast %149 : vector<1x32xf32> to vector<16x32xf32>
    %151 = arith.addf %148, %150 : vector<16x32xf32>
    %152 = vector.extract_strided_slice %144 {offsets = [0, 32], sizes = [32, 64], strides = [1, 1]} : vector<32x128xf32> to vector<32x64xf32>
    %cst_50 = arith.constant dense<0.000000e+00> : vector<16x64xf32>
    %153 = tpu.matmul %3, %152, %cst_50 {dimension_numbers = #tpu.dot_dimension_numbers<[1], [0], [0], [1], [0, 0, 1, 1], [], []>} : vector<16x32xf32>, vector<32x64xf32>, vector<16x64xf32> -> vector<16x64xf32>
    %154 = vector.extract_strided_slice %146 {offsets = [0, 32], sizes = [1, 64], strides = [1, 1]} : vector<1x128xf32> to vector<1x64xf32>
    %155 = vector.broadcast %154 : vector<1x64xf32> to vector<16x64xf32>
    %156 = arith.addf %153, %155 : vector<16x64xf32>
    %157 = vector.extract_strided_slice %156 {offsets = [0, 0], sizes = [16, 32], strides = [1, 1]} : vector<16x64xf32> to vector<16x32xf32>
    %158 = vector.extract_strided_slice %156 {offsets = [0, 32], sizes = [16, 32], strides = [1, 1]} : vector<16x64xf32> to vector<16x32xf32>
    %159 = vector.shape_cast %151 : vector<16x32xf32> to vector<2x8x32xf32>
    %160 = vector.shape_cast %157 : vector<16x32xf32> to vector<2x8x32xf32>
    %161 = vector.shape_cast %158 : vector<16x32xf32> to vector<2x8x32xf32>
    %162 = vector.extract_strided_slice %159 {offsets = [0, 0, 0], sizes = [2, 8, 8], strides = [1, 1, 1]} : vector<2x8x32xf32> to vector<2x8x8xf32>
    %163 = vector.extract_strided_slice %160 {offsets = [0, 0, 0], sizes = [2, 8, 8], strides = [1, 1, 1]} : vector<2x8x32xf32> to vector<2x8x8xf32>
    %164 = vector.extract_strided_slice %161 {offsets = [0, 0, 0], sizes = [2, 8, 8], strides = [1, 1, 1]} : vector<2x8x32xf32> to vector<2x8x8xf32>
    "tpu.trace_start"() <{level = 10 : i32, message = "bqd,bkd->bqk"}> : () -> ()
    %cst_51 = arith.constant dense<0.000000e+00> : vector<2x8x8xf32>
    %165 = tpu.matmul %162, %163, %cst_51 {dimension_numbers = #tpu.dot_dimension_numbers<[2], [2], [1], [1], [0, 0, 0, 1, 1, 1], [0], [0]>} : vector<2x8x8xf32>, vector<2x8x8xf32>, vector<2x8x8xf32> -> vector<2x8x8xf32>
    "tpu.trace_stop"() : () -> ()
    %cst_52 = arith.constant 0.176776692 : f32
    %166 = vector.broadcast %cst_52 : f32 to vector<2x8x8xf32>
    %167 = arith.mulf %165, %166 : vector<2x8x8xf32>
    %cst_53 = arith.constant dense<0xFF800000> : vector<2x8xf32>
    %168 = vector.multi_reduction <maximumf>, %167, %cst_53 [2] : vector<2x8x8xf32> to vector<2x8xf32>
    %169 = vector.shape_cast %168 : vector<2x8xf32> to vector<2x8x1xf32>
    %170 = vector.broadcast %169 : vector<2x8x1xf32> to vector<2x8x8xf32>
    %171 = arith.subf %167, %170 : vector<2x8x8xf32>
    %172 = math.exp %171 : vector<2x8x8xf32>
    %cst_54 = arith.constant dense<0.000000e+00> : vector<2x8xf32>
    %173 = vector.multi_reduction <add>, %172, %cst_54 [2] : vector<2x8x8xf32> to vector<2x8xf32>
    %174 = vector.shape_cast %173 : vector<2x8xf32> to vector<2x8x1xf32>
    %175 = tpu.reciprocal %174 {approx = true} : vector<2x8x1xf32> -> vector<2x8x1xf32>
    %176 = vector.broadcast %175 : vector<2x8x1xf32> to vector<2x8x8xf32>
    %177 = arith.mulf %172, %176 : vector<2x8x8xf32>
    "tpu.trace_start"() <{level = 10 : i32, message = "bqk,bkd->bqd"}> : () -> ()
    %cst_55 = arith.constant dense<0.000000e+00> : vector<2x8x8xf32>
    %178 = tpu.matmul %177, %164, %cst_55 {dimension_numbers = #tpu.dot_dimension_numbers<[2], [1], [1], [2], [0, 0, 0, 1, 1, 2], [0], [0]>} : vector<2x8x8xf32>, vector<2x8x8xf32>, vector<2x8x8xf32> -> vector<2x8x8xf32>
    "tpu.trace_stop"() : () -> ()
    %179 = vector.shape_cast %178 : vector<2x8x8xf32> to vector<16x8xf32>
    %180 = vector.extract_strided_slice %159 {offsets = [0, 0, 8], sizes = [2, 8, 8], strides = [1, 1, 1]} : vector<2x8x32xf32> to vector<2x8x8xf32>
    %181 = vector.extract_strided_slice %160 {offsets = [0, 0, 8], sizes = [2, 8, 8], strides = [1, 1, 1]} : vector<2x8x32xf32> to vector<2x8x8xf32>
    %182 = vector.extract_strided_slice %161 {offsets = [0, 0, 8], sizes = [2, 8, 8], strides = [1, 1, 1]} : vector<2x8x32xf32> to vector<2x8x8xf32>
    "tpu.trace_start"() <{level = 10 : i32, message = "bqd,bkd->bqk"}> : () -> ()
    %cst_56 = arith.constant dense<0.000000e+00> : vector<2x8x8xf32>
    %183 = tpu.matmul %180, %181, %cst_56 {dimension_numbers = #tpu.dot_dimension_numbers<[2], [2], [1], [1], [0, 0, 0, 1, 1, 1], [0], [0]>} : vector<2x8x8xf32>, vector<2x8x8xf32>, vector<2x8x8xf32> -> vector<2x8x8xf32>
    "tpu.trace_stop"() : () -> ()
    %cst_57 = arith.constant 0.176776692 : f32
    %184 = vector.broadcast %cst_57 : f32 to vector<2x8x8xf32>
    %185 = arith.mulf %183, %184 : vector<2x8x8xf32>
    %cst_58 = arith.constant dense<0xFF800000> : vector<2x8xf32>
    %186 = vector.multi_reduction <maximumf>, %185, %cst_58 [2] : vector<2x8x8xf32> to vector<2x8xf32>
    %187 = vector.shape_cast %186 : vector<2x8xf32> to vector<2x8x1xf32>
    %188 = vector.broadcast %187 : vector<2x8x1xf32> to vector<2x8x8xf32>
    %189 = arith.subf %185, %188 : vector<2x8x8xf32>
    %190 = math.exp %189 : vector<2x8x8xf32>
    %cst_59 = arith.constant dense<0.000000e+00> : vector<2x8xf32>
    %191 = vector.multi_reduction <add>, %190, %cst_59 [2] : vector<2x8x8xf32> to vector<2x8xf32>
    %192 = vector.shape_cast %191 : vector<2x8xf32> to vector<2x8x1xf32>
    %193 = tpu.reciprocal %192 {approx = true} : vector<2x8x1xf32> -> vector<2x8x1xf32>
    %194 = vector.broadcast %193 : vector<2x8x1xf32> to vector<2x8x8xf32>
    %195 = arith.mulf %190, %194 : vector<2x8x8xf32>
    "tpu.trace_start"() <{level = 10 : i32, message = "bqk,bkd->bqd"}> : () -> ()
    %cst_60 = arith.constant dense<0.000000e+00> : vector<2x8x8xf32>
    %196 = tpu.matmul %195, %182, %cst_60 {dimension_numbers = #tpu.dot_dimension_numbers<[2], [1], [1], [2], [0, 0, 0, 1, 1, 2], [0], [0]>} : vector<2x8x8xf32>, vector<2x8x8xf32>, vector<2x8x8xf32> -> vector<2x8x8xf32>
    "tpu.trace_stop"() : () -> ()
    %197 = vector.shape_cast %196 : vector<2x8x8xf32> to vector<16x8xf32>
    %198 = vector.extract_strided_slice %159 {offsets = [0, 0, 16], sizes = [2, 8, 8], strides = [1, 1, 1]} : vector<2x8x32xf32> to vector<2x8x8xf32>
    %199 = vector.extract_strided_slice %160 {offsets = [0, 0, 16], sizes = [2, 8, 8], strides = [1, 1, 1]} : vector<2x8x32xf32> to vector<2x8x8xf32>
    %200 = vector.extract_strided_slice %161 {offsets = [0, 0, 16], sizes = [2, 8, 8], strides = [1, 1, 1]} : vector<2x8x32xf32> to vector<2x8x8xf32>
    "tpu.trace_start"() <{level = 10 : i32, message = "bqd,bkd->bqk"}> : () -> ()
    %cst_61 = arith.constant dense<0.000000e+00> : vector<2x8x8xf32>
    %201 = tpu.matmul %198, %199, %cst_61 {dimension_numbers = #tpu.dot_dimension_numbers<[2], [2], [1], [1], [0, 0, 0, 1, 1, 1], [0], [0]>} : vector<2x8x8xf32>, vector<2x8x8xf32>, vector<2x8x8xf32> -> vector<2x8x8xf32>
    "tpu.trace_stop"() : () -> ()
    %cst_62 = arith.constant 0.176776692 : f32
    %202 = vector.broadcast %cst_62 : f32 to vector<2x8x8xf32>
    %203 = arith.mulf %201, %202 : vector<2x8x8xf32>
    %cst_63 = arith.constant dense<0xFF800000> : vector<2x8xf32>
    %204 = vector.multi_reduction <maximumf>, %203, %cst_63 [2] : vector<2x8x8xf32> to vector<2x8xf32>
    %205 = vector.shape_cast %204 : vector<2x8xf32> to vector<2x8x1xf32>
    %206 = vector.broadcast %205 : vector<2x8x1xf32> to vector<2x8x8xf32>
    %207 = arith.subf %203, %206 : vector<2x8x8xf32>
    %208 = math.exp %207 : vector<2x8x8xf32>
    %cst_64 = arith.constant dense<0.000000e+00> : vector<2x8xf32>
    %209 = vector.multi_reduction <add>, %208, %cst_64 [2] : vector<2x8x8xf32> to vector<2x8xf32>
    %210 = vector.shape_cast %209 : vector<2x8xf32> to vector<2x8x1xf32>
    %211 = tpu.reciprocal %210 {approx = true} : vector<2x8x1xf32> -> vector<2x8x1xf32>
    %212 = vector.broadcast %211 : vector<2x8x1xf32> to vector<2x8x8xf32>
    %213 = arith.mulf %208, %212 : vector<2x8x8xf32>
    "tpu.trace_start"() <{level = 10 : i32, message = "bqk,bkd->bqd"}> : () -> ()
    %cst_65 = arith.constant dense<0.000000e+00> : vector<2x8x8xf32>
    %214 = tpu.matmul %213, %200, %cst_65 {dimension_numbers = #tpu.dot_dimension_numbers<[2], [1], [1], [2], [0, 0, 0, 1, 1, 2], [0], [0]>} : vector<2x8x8xf32>, vector<2x8x8xf32>, vector<2x8x8xf32> -> vector<2x8x8xf32>
    "tpu.trace_stop"() : () -> ()
    %215 = vector.shape_cast %214 : vector<2x8x8xf32> to vector<16x8xf32>
    %216 = vector.extract_strided_slice %159 {offsets = [0, 0, 24], sizes = [2, 8, 8], strides = [1, 1, 1]} : vector<2x8x32xf32> to vector<2x8x8xf32>
    %217 = vector.extract_strided_slice %160 {offsets = [0, 0, 24], sizes = [2, 8, 8], strides = [1, 1, 1]} : vector<2x8x32xf32> to vector<2x8x8xf32>
    %218 = vector.extract_strided_slice %161 {offsets = [0, 0, 24], sizes = [2, 8, 8], strides = [1, 1, 1]} : vector<2x8x32xf32> to vector<2x8x8xf32>
    "tpu.trace_start"() <{level = 10 : i32, message = "bqd,bkd->bqk"}> : () -> ()
    %cst_66 = arith.constant dense<0.000000e+00> : vector<2x8x8xf32>
    %219 = tpu.matmul %216, %217, %cst_66 {dimension_numbers = #tpu.dot_dimension_numbers<[2], [2], [1], [1], [0, 0, 0, 1, 1, 1], [0], [0]>} : vector<2x8x8xf32>, vector<2x8x8xf32>, vector<2x8x8xf32> -> vector<2x8x8xf32>
    "tpu.trace_stop"() : () -> ()
    %cst_67 = arith.constant 0.176776692 : f32
    %220 = vector.broadcast %cst_67 : f32 to vector<2x8x8xf32>
    %221 = arith.mulf %219, %220 : vector<2x8x8xf32>
    %cst_68 = arith.constant dense<0xFF800000> : vector<2x8xf32>
    %222 = vector.multi_reduction <maximumf>, %221, %cst_68 [2] : vector<2x8x8xf32> to vector<2x8xf32>
    %223 = vector.shape_cast %222 : vector<2x8xf32> to vector<2x8x1xf32>
    %224 = vector.broadcast %223 : vector<2x8x1xf32> to vector<2x8x8xf32>
    %225 = arith.subf %221, %224 : vector<2x8x8xf32>
    %226 = math.exp %225 : vector<2x8x8xf32>
    %cst_69 = arith.constant dense<0.000000e+00> : vector<2x8xf32>
    %227 = vector.multi_reduction <add>, %226, %cst_69 [2] : vector<2x8x8xf32> to vector<2x8xf32>
    %228 = vector.shape_cast %227 : vector<2x8xf32> to vector<2x8x1xf32>
    %229 = tpu.reciprocal %228 {approx = true} : vector<2x8x1xf32> -> vector<2x8x1xf32>
    %230 = vector.broadcast %229 : vector<2x8x1xf32> to vector<2x8x8xf32>
    %231 = arith.mulf %226, %230 : vector<2x8x8xf32>
    "tpu.trace_start"() <{level = 10 : i32, message = "bqk,bkd->bqd"}> : () -> ()
    %cst_70 = arith.constant dense<0.000000e+00> : vector<2x8x8xf32>
    %232 = tpu.matmul %231, %218, %cst_70 {dimension_numbers = #tpu.dot_dimension_numbers<[2], [1], [1], [2], [0, 0, 0, 1, 1, 2], [0], [0]>} : vector<2x8x8xf32>, vector<2x8x8xf32>, vector<2x8x8xf32> -> vector<2x8x8xf32>
    "tpu.trace_stop"() : () -> ()
    %233 = vector.shape_cast %232 : vector<2x8x8xf32> to vector<16x8xf32>
    %234 = tpu.concatenate %179, %197, %215, %233 in 1 : vector<16x8xf32>, vector<16x8xf32>, vector<16x8xf32>, vector<16x8xf32> -> vector<16x32xf32>
    %235 = vector.extract_strided_slice %144 {offsets = [0, 96], sizes = [32, 32], strides = [1, 1]} : vector<32x128xf32> to vector<32x32xf32>
    %cst_71 = arith.constant dense<0.000000e+00> : vector<16x32xf32>
    %236 = tpu.matmul %234, %235, %cst_71 {dimension_numbers = #tpu.dot_dimension_numbers<[1], [0], [0], [1], [0, 0, 1, 1], [], []>} : vector<16x32xf32>, vector<32x32xf32>, vector<16x32xf32> -> vector<16x32xf32>
    %237 = vector.extract_strided_slice %146 {offsets = [0, 96], sizes = [1, 32], strides = [1, 1]} : vector<1x128xf32> to vector<1x32xf32>
    %238 = vector.broadcast %237 : vector<1x32xf32> to vector<16x32xf32>
    %239 = arith.addf %236, %238 : vector<16x32xf32>
    %240 = arith.addf %120, %239 : vector<16x32xf32>
    %241 = vector.extract_strided_slice %4 {offsets = [4, 0], sizes = [1, 32], strides = [1, 1]} : vector<6x32xf32> to vector<1x32xf32>
    %242 = vector.extract_strided_slice %4 {offsets = [5, 0], sizes = [1, 32], strides = [1, 1]} : vector<6x32xf32> to vector<1x32xf32>
    %cst_72 = arith.constant dense<0.000000e+00> : vector<16xf32>
    %243 = vector.multi_reduction <add>, %240, %cst_72 [1] : vector<16x32xf32> to vector<16xf32>
    %244 = vector.shape_cast %243 : vector<16xf32> to vector<16x1xf32>
    %cst_73 = arith.constant 3.200000e+01 : f32
    %245 = vector.broadcast %cst_73 : f32 to vector<16x1xf32>
    %246 = arith.divf %244, %245 : vector<16x1xf32>
    %247 = vector.broadcast %246 : vector<16x1xf32> to vector<16x32xf32>
    %248 = arith.subf %240, %247 : vector<16x32xf32>
    %249 = arith.mulf %248, %248 : vector<16x32xf32>
    %cst_74 = arith.constant dense<0.000000e+00> : vector<16xf32>
    %250 = vector.multi_reduction <add>, %249, %cst_74 [1] : vector<16x32xf32> to vector<16xf32>
    %251 = vector.shape_cast %250 : vector<16xf32> to vector<16x1xf32>
    %cst_75 = arith.constant 3.200000e+01 : f32
    %252 = vector.broadcast %cst_75 : f32 to vector<16x1xf32>
    %253 = arith.divf %251, %252 : vector<16x1xf32>
    %cst_76 = arith.constant 9.99999997E-7 : f32
    %254 = vector.broadcast %cst_76 : f32 to vector<16x1xf32>
    %255 = arith.addf %253, %254 : vector<16x1xf32>
    %256 = math.rsqrt %255 : vector<16x1xf32>
    %257 = vector.broadcast %256 : vector<16x1xf32> to vector<16x32xf32>
    %258 = arith.mulf %248, %257 : vector<16x32xf32>
    %259 = vector.broadcast %241 : vector<1x32xf32> to vector<16x32xf32>
    %260 = arith.mulf %258, %259 : vector<16x32xf32>
    %261 = vector.broadcast %242 : vector<1x32xf32> to vector<16x32xf32>
    %262 = arith.addf %260, %261 : vector<16x32xf32>
    %c0_77 = arith.constant 0 : index
    %c0_78 = arith.constant 0 : index
    %263 = vector.load %arg5[%c0_77, %c0_78] : memref<32x64xf32, #tpu.memory_space<vmem>>, vector<32x64xf32>
    %cst_79 = arith.constant dense<0.000000e+00> : vector<16x64xf32>
    %264 = tpu.matmul %262, %263, %cst_79 {dimension_numbers = #tpu.dot_dimension_numbers<[1], [0], [0], [1], [0, 0, 1, 1], [], []>} : vector<16x32xf32>, vector<32x64xf32>, vector<16x64xf32> -> vector<16x64xf32>
    %c0_80 = arith.constant 0 : index
    %c0_81 = arith.constant 0 : index
    %265 = vector.load %arg6[%c0_80, %c0_81] : memref<1x64xf32, #tpu.memory_space<vmem>>, vector<1x64xf32>
    %266 = vector.broadcast %265 : vector<1x64xf32> to vector<16x64xf32>
    %267 = arith.addf %264, %266 : vector<16x64xf32>
    %cst_82 = arith.constant 0.000000e+00 : f32
    %268 = vector.broadcast %cst_82 : f32 to vector<16x64xf32>
    %269 = arith.maximumf %267, %268 : vector<16x64xf32>
    %c0_83 = arith.constant 0 : index
    %c0_84 = arith.constant 0 : index
    %270 = vector.load %arg7[%c0_83, %c0_84] : memref<64x32xf32, #tpu.memory_space<vmem>>, vector<64x32xf32>
    %cst_85 = arith.constant dense<0.000000e+00> : vector<16x32xf32>
    %271 = tpu.matmul %269, %270, %cst_85 {dimension_numbers = #tpu.dot_dimension_numbers<[1], [0], [0], [1], [0, 0, 1, 1], [], []>} : vector<16x64xf32>, vector<64x32xf32>, vector<16x32xf32> -> vector<16x32xf32>
    %c0_86 = arith.constant 0 : index
    %c0_87 = arith.constant 0 : index
    %272 = vector.load %arg8[%c0_86, %c0_87] : memref<1x32xf32, #tpu.memory_space<vmem>>, vector<1x32xf32>
    %273 = vector.broadcast %272 : vector<1x32xf32> to vector<16x32xf32>
    %274 = arith.addf %271, %273 : vector<16x32xf32>
    %275 = arith.addf %240, %274 : vector<16x32xf32>
    %276 = vector.shape_cast %275 : vector<16x32xf32> to vector<2x8x32xf32>
    %c0_88 = arith.constant 0 : index
    %c0_89 = arith.constant 0 : index
    %c0_90 = arith.constant 0 : index
    %277 = vector.load %arg9[%c0_88, %c0_89, %c0_90] : memref<2x8x32xf32, #tpu.memory_space<vmem>>, vector<2x8x32xf32>
    tpu.vector_store %arg9[%c0_88, %c0_89, %c0_90], %276 {strides = array<i32>} : memref<2x8x32xf32, #tpu.memory_space<vmem>>, vector<2x8x32xf32>,
    return
  }
}

</mosaic_0001>

<bundles_post_ra>
// kernel: tpu_custom_call.1
= control target key start
LH: loop header
LB: loop body
LE: loop exit
PB: predicated region body
PF: predicated region fallthrough
CT: control target
= control target key end

     0   :  { %14 = vsyncpa [#allocation3], 0  ;;  %s4913_s0 = inlined_call_operand.hbm [shape: f32[2,8,32], index: 0, kind: input, shape index: {}]   ;;  %s4914_s1 = inlined_call_operand.hbm [shape: f32[2,8,32], index: 1, kind: input, shape index: {}]   ;;  %s4915_s2 = inlined_call_operand.vmem [shape: f32[6,32], index: 2, kind: input, shape index: {}]   ;;  %s4916_s3 = inlined_call_operand.vmem [shape: f32[2,32,128], index: 3, kind: input, shape index: {}]   ;;  %s4917_s4 = inlined_call_operand.vmem [shape: f32[2,1,128], index: 4, kind: input, shape index: {}]   ;;  %s4918_s5 = inlined_call_operand.vmem [shape: f32[32,64], index: 5, kind: input, shape index: {}]   ;;  %s4919_s6 = inlined_call_operand.vmem [shape: f32[1,64], index: 6, kind: input, shape index: {}]   ;;  %s4920_s7 = inlined_call_operand.vmem [shape: f32[64,32], index: 7, kind: input, shape index: {}]   ;;  %s4921_s8 = inlined_call_operand.vmem [shape: f32[1,32], index: 8, kind: input, shape index: {}]   ;;  %s4922_s9 = inlined_call_operand.hbm [shape: f32[2,8,32], index: 9, kind: output, shape index: {}]  }
   0x1   :  { %15 = vsyncpa [#allocation6], 0 }
   0x2   :  { %16 = vsyncpa [#allocation4], 0  ;;  %s4284_s30 = smov [#allocation2]   ;;  %s4212_s13 = scalar_lea.hbm %s4913_s0, 256 }
   0x3   :  { %s22_s10 = sshll.u32 %s4284_s30, 4  ;;  %p4213_p0 = scmp.ne.s32.totalorder %s4913_s0, %s4212_s13  ;;  %s23_s10 = int_to_ptr.vmem [resolvable:$true] %s22_s10 }
   0x4   :  { %p4216_p1 = scmp.lt.u32.totalorder %s4212_s13, %s4913_s0 }
   0x6   :  { %p4218_p2 = pnand %p4216_p1, %p4213_p0 }
   0x8   :  { %4221 = shalt.err (!%p4218_p2)
}
   0x9   :  { %s4222_s18 = scalar_lea.vmem %s23_s10, 256  ;;  %p4227_p4 = scmp.lt.s32.totalorder %s23_s10, %s23_s10 }
   0xa   :  { %p4223_p3 = scmp.ne.s32.totalorder %s23_s10, %s4222_s18  ;;  %p4228_p5 = scmp.lt.s32.totalorder %s4222_s18, %s4222_s18 }
   0xc   :  { %p4229_p6 = por %p4228_p5, %p4227_p4 }
   0xe   :  { %p4230_p7 = pnand %p4229_p6, %p4223_p3 }
  0x10   :  { %4233 = shalt.err (!%p4230_p7)
}
  0x11   :  { %s4285_s19 = smov 128   ;;  %s4286_s20 = smov 8  }
  0x12   :  { %28 = dma.hbm_to_vmem [thread:$0]  %s4913_s0, 256, %s23_s10, [#allocation3], %s4285_s19, %s4285_s19, %s4286_s20  }
  0x13   :  { %s4287_s23 = smov [#allocation5]   ;;  %s4234_s27 = scalar_lea.hbm %s4914_s1, 256 }
  0x14   :  { %s34_s24 = sshll.u32 %s4287_s23, 4  ;;  %p4235_p8 = scmp.ne.s32.totalorder %s4914_s1, %s4234_s27  ;;  %s35_s24 = int_to_ptr.vmem [resolvable:$true] %s34_s24 }
  0x15   :  { %p4238_p9 = scmp.lt.u32.totalorder %s4234_s27, %s4914_s1 }
  0x17   :  { %p4240_p10 = pnand %p4238_p9, %p4235_p8 }
  0x19   :  { %4243 = shalt.err (!%p4240_p10)
}
  0x1a   :  { %s4244_s12 = scalar_lea.vmem %s35_s24, 256  ;;  %p4249_p12 = scmp.lt.s32.totalorder %s35_s24, %s35_s24 }
  0x1b   :  { %p4245_p11 = scmp.ne.s32.totalorder %s35_s24, %s4244_s12  ;;  %p4250_p13 = scmp.lt.s32.totalorder %s4244_s12, %s4244_s12 }
  0x1d   :  { %p4251_p0 = por %p4250_p13, %p4249_p12 }
  0x1f   :  { %p4252_p1 = pnand %p4251_p0, %p4245_p11 }
  0x21   :  { %4255 = shalt.err (!%p4252_p1)
}
  0x22   :  { %40 = dma.hbm_to_vmem [thread:$0]  %s4914_s1, 256, %s35_s24, [#allocation6], %s4285_s19, %s4285_s19, %s4286_s20  }
  0x23   :  { %4278 = dma.done.wait [#allocation3], 256  }
  0x24   :  { %4279 = vsyncadd [#allocation3], 4294967040 }
  0x25   :  { %4280 = dma.done.wait [#allocation6], 256  }
  0x26   :  { %4281 = vsyncadd [#allocation6], 4294967040  ;;  %vm66_vm0 = vcmask 261120   ;;  %v4385_v0 = vld [vmem:[#allocation2] sm:$0xff]  ;;  %v4387_v1 = vld [vmem:[#allocation2 + $0x8] sm:$0xff]  ;;  %v94_v23 = vlaneseq  ;;  %v4288_v42 = vmov 0.0  }
  0x27   :  { %v67_v2 = vsel %vm66_vm0, %v4385_v0, 0.0  ;;  %v70_v3 = vsel %vm66_vm0, %v4387_v1, 0.0  ;;  %v4400_v14 = vld [vmem:[%s4916_s3] sm:$0xff]  ;;  %v4405_v15 = vld [vmem:[%s4916_s3 + $0x8] sm:$0xff]  ;;  %v4410_v16 = vld [vmem:[%s4916_s3 + $0x10] sm:$0xff]  ;;  %3796 = vmatprep.subr.mxu0 %v4288_v42  ;;  %vm4289_vm1 = vmmov 0  }
  0x28   :  { %68 = vadd.xlane.f32.xlu0 %v67_v2  ;;  %v4105_v17 = vpack.i.bf16 %v4405_v15, %v4400_v14  ;;  %v4020_v18 = vpack.c.bf16 %v4405_v15, %v4400_v14  ;;  %v4419_v19 = vld [vmem:[%s4916_s3 + $0x18] sm:$0xff]  ;;  %v4423_v27 = vshrl.u32 %v94_v23, 7  ;;  %v4429_v30 = vld [vmem:[%s4915_s2] sm:$0x3f]  ;;  %3798 = vmatprep.mubr.msk.f32.mxu0 %vm4289_vm1, %v4288_v42  ;;  %s4290_s26 = smov 96   ;;  %vm201_vm2 = vcmask 64512  }
  0x29   :  { %v4024_v20 = vpack.c.bf16 %v4419_v19, %v4410_v16  ;;  %v4445_v43 = vld [vmem:[%s4917_s4] ss:$0 sm:$0xff]  ;;  %s4291_s27 = smov 64   ;;  %s4292_s28 = smov 88   ;;  %vm1554_vm3 = vcmask 195584   ;;  %vm1551_vm4 = vcmask 130048  }
  0x2a   :  { %4021 = vmatprep.subr.bf16.mxu1 %v4020_v18  ;;  %v96_v29 = vsub.s32 0, %v4423_v27  ;;  %v102_v31 = vsub.s32 1, %v4423_v27  ;;  %s4293_s29 = smov 120   ;;  %s4294_s30 = smov 56   ;;  %vm3490_vm5 = vcmask 523264  }
  0x2b   :  { %4023 = vmatpush3.bf16.msra.mxu1 %v4020_v18  ;;  %s4295_s11 = smov 80   ;;  %s4296_s12 = smov 112  }
  0x2c   :  { %71 = vadd.xlane.f32.xlu0 %v70_v3  ;;  %4025 = vmatprep.subr.bf16.mxu1 %v4024_v20  ;;  %v97_v32 = vrot.slane %v4429_v30, %v96_v29  ;;  %v103_v35 = vrot.slane %v4429_v30, %v102_v31  ;;  %s4297_s0 = smov 48   ;;  %s4298_s10 = smov 72  }
  0x2d   :  { %s4299_s1 = smov 104   ;;  %s4300_s13 = smov 40  }
  0x2e   :  { %s4301_s14 = smov 32   ;;  %s4302_s15 = smov 16  }
  0x2f   :  { %4027 = vmatpush3.bf16.msra.mxu1 %v4024_v20  ;;  %s4303_s16 = smov 24  }
  0x30   :  { %3786 = vmatprep.subr.mxu1 %v4288_v42 }
  0xb5   :  { %v69_v4 = vpop.xlane.xlu0 %68 }
  0xb6   :  { %v74_v5 = vmul.f32 0.03125, %v69_v4 }
  0xb8   :  { %v76_v6 = vsub.f32 %v4385_v0, %v74_v5 }
  0xb9   :  { %v72_v7 = vpop.xlane.xlu0 %71 }
  0xba   :  { %v75_v8 = vmul.f32 0.03125, %v72_v7  ;;  %v78_v9 = vmul.f32 %v76_v6, %v76_v6 }
  0xbc   :  { %v77_v10 = vsub.f32 %v4387_v1, %v75_v8  ;;  %v80_v11 = vsel %vm66_vm0, %v78_v9, 0.0 }
  0xbd   :  { %81 = vadd.xlane.f32.xlu1 %v80_v11 }
  0xbe   :  { %v79_v12 = vmul.f32 %v77_v10, %v77_v10 }
  0xc0   :  { %v83_v13 = vsel %vm66_vm0, %v79_v12, 0.0 }
  0xc1   :  { %84 = vadd.xlane.f32.xlu1 %v83_v13 }
 0x14a   :  { %v82_v21 = vpop.xlane.xlu1 %81 }
 0x14b   :  { %v86_v22 = vmul.f32 0.03125, %v82_v21 }
 0x14d   :  { %v88_v24 = vadd.f32 1e-06, %v86_v22 }
 0x14e   :  { %v85_v25 = vpop.xlane.xlu1 %84 }
 0x14f   :  { %4135 = vrsqrt.f32 %v88_v24  ;;  %v87_v26 = vmul.f32 0.03125, %v85_v25 }
 0x151   :  { %v89_v28 = vadd.f32 1e-06, %v87_v26 }
 0x153   :  { %4137 = vrsqrt.f32 %v89_v28 }
 0x159   :  { %v4136_v33 = vpop.eup %4135 }
 0x15a   :  { %v92_v34 = vmul.f32 %v4136_v33, %v76_v6 }
 0x15c   :  { %v98_v36 = vmul.f32 %v97_v32, %v92_v34 }
 0x15d   :  { %v4138_v37 = vpop.eup %4137 }
 0x15e   :  { %v93_v38 = vmul.f32 %v4138_v37, %v77_v10  ;;  %v104_v39 = vadd.f32 %v103_v35, %v98_v36 }
 0x160   :  { %v99_v40 = vmul.f32 %v97_v32, %v93_v38  ;;  %3783 = vmatprep.mubr.msk.f32.mxu1 %vm66_vm0, %v104_v39 }
 0x162   :  { %v105_v41 = vadd.f32 %v103_v35, %v99_v40 }
 0x164   :  { %3784 = vmatmul.mubr.msk.f32.vlgmr.msra.gmra.mrb[0].mxu1 %vm66_vm0, %v105_v41 }
 0x165   :  { %3788 = vmatprep.mubr.msk.f32.mxu1 %vm4289_vm1, %v4288_v42 }
 0x237   :  { %v3785_v44 = vpop.f32.mrb[0].mxu1 }
 0x238   :  { %v4448_v45 = vadd.f32 %v3785_v44, %v4445_v43  ;;  %v189_v46 = vpop.f32.mrb[1].mxu1 }
 0x239   :  { %v4451_v47 = vadd.f32 %v4445_v43, %v189_v46 }
 0x23a   :  { %277 = vrot.lane.b32.xlu1 %v4448_v45, %s4290_s26 }
 0x23b   :  { %199 = vrot.lane.b32.xlu0 %v4451_v47, %s4290_s26 }
 0x2ac   :  { %v278_v49 = vpop.permute.xlu1 %277 }
 0x2ad   :  { %v200_v48 = vpop.permute.xlu0 %199 }
 0x2ae   :  { %3787 = vmatpush3.xpose.msk.msra.mxu1 %vm201_vm2, %v200_v48 }
 0x2af   :  { %3791 = vmatprep.subr.mxu1 %v4288_v42 }
 0x2b1   :  { %3789 = vmatmul.mubr.msk.f32.vlgmr.msra.gmra.mrb[2].mxu1 %vm201_vm2, %v4451_v47 }
 0x2b2   :  { %3792 = vmatpush3.xpose.msk.msra.mxu1 %vm201_vm2, %v278_v49  ;;  %3793 = vmatprep.mubr.msk.f32.mxu1 %vm4289_vm1, %v4288_v42 }
 0x2b3   :  { %3801 = vmatprep.subr.mxu1 %v4288_v42 }
 0x2b5   :  { %3794 = vmatmul.mubr.msk.f32.vlgmr.msra.gmra.mrb[4].mxu1 %vm201_vm2, %v4448_v45 }
 0x2b6   :  { %3803 = vmatprep.mubr.msk.f32.mxu1 %vm4289_vm1, %v4288_v42 }
 0x384   :  { %v272_v50 = vpop.f32.mrb[2].mxu1 }
 0x385   :  { %v353_v51 = vmul.f32 0.17677669, %v272_v50  ;;  %v3790_v52 = vpop.f32.mrb[3].mxu1 }
 0x387   :  { %v355_v53 = vsel %vm201_vm2, %v353_v51, -inf }
 0x388   :  { %356 = vmax.xlane.f32.xlu1 %v355_v53  ;;  %v349_v54 = vpop.f32.mrb[4].mxu1 }
 0x389   :  { %v354_v55 = vmul.f32 0.17677669, %v349_v54  ;;  %v3795_v56 = vpop.f32.mrb[5].mxu1 }
 0x38b   :  { %v358_v57 = vsel %vm201_vm2, %v354_v55, -inf }
 0x38c   :  { %359 = vmax.xlane.f32.xlu0 %v358_v57 }
 0x399   :  { %453 = vrot.lane.b32.xlu1 %v4448_v45, %s4291_s27 }
 0x39d   :  { %531 = vrot.lane.b32.xlu1 %v4451_v47, %s4292_s28 }
 0x3a1   :  { %609 = vrot.lane.b32.xlu1 %v4448_v45, %s4292_s28 }
 0x3a2   :  { %377 = vrot.lane.b32.xlu0 %v4451_v47, %s4291_s27 }
 0x415   :  { %v357_v58 = vpop.xlane.xlu1 %356 }
 0x416   :  { %v361_v59 = vsub.f32 %v353_v51, %v357_v58 }
 0x418   :  { %v363_v60 = vmul.f32 1.442695, %v361_v59 }
 0x419   :  { %v454_v61 = vpop.permute.xlu1 %453  ;;  %v360_v62 = vpop.xlane.xlu0 %359 }
 0x41a   :  { %4139 = vpow2.f32 %v363_v60  ;;  %v362_v63 = vsub.f32 %v354_v55, %v360_v62  ;;  %3802 = vmatpush3.msra.mxu1 %v454_v61 }
 0x41b   :  { %3811 = vmatprep.subr.mxu1 %v4288_v42 }
 0x41c   :  { %v365_v2 = vmul.f32 1.442695, %v362_v63 }
 0x41d   :  { %v378_v3 = vpop.permute.xlu0 %377  ;;  %v532_v8 = vpop.permute.xlu1 %531 }
 0x41e   :  { %4141 = vpow2.f32 %v365_v2  ;;  %3797 = vmatpush3.msra.mxu0 %v378_v3 }
 0x41f   :  { %3806 = vmatprep.subr.mxu0 %v4288_v42 }
 0x421   :  { %v610_v9 = vpop.permute.xlu1 %609 }
 0x424   :  { %v4140_v4 = vpop.eup %4139 }
 0x425   :  { %v367_v5 = vsel %vm201_vm2, %v4140_v4, 0.0 }
 0x426   :  { %368 = vadd.xlane.f32.xlu0 %v367_v5 }
 0x428   :  { %v4142_v6 = vpop.eup %4141 }
 0x429   :  { %v370_v7 = vsel %vm201_vm2, %v4142_v6, 0.0 }
 0x42a   :  { %371 = vadd.xlane.f32.xlu1 %v370_v7 }
 0x43b   :  { %607 = vrot.lane.b32.xlu1 %v4448_v45, %s4293_s29 }
 0x43c   :  { %529 = vrot.lane.b32.xlu0 %v4451_v47, %s4293_s29 }
 0x4b3   :  { %v369_v10 = vpop.xlane.xlu0 %368 }
 0x4b4   :  { %4143 = vrcp.f32 %v369_v10 }
 0x4b7   :  { %v372_v11 = vpop.xlane.xlu1 %371  ;;  %v530_v21 = vpop.permute.xlu0 %529 }
 0x4b8   :  { %4145 = vrcp.f32 %v372_v11 }
 0x4bb   :  { %v608_v22 = vpop.permute.xlu1 %607 }
 0x4be   :  { %v4144_v12 = vpop.eup %4143 }
 0x4bf   :  { %v375_v13 = vmul.f32 %v4144_v12, %v4140_v4 }
 0x4c1   :  { %3799 = vmatmul.mubr.msk.f32.vlgmr.msra.gmra.mrb[0].mxu0 %vm201_vm2, %v375_v13 }
 0x4c2   :  { %v4146_v18 = vpop.eup %4145  ;;  %3807 = vmatpush3.xpose.msk.msra.mxu0 %vm201_vm2, %v532_v8  ;;  %3808 = vmatprep.mubr.msk.f32.mxu0 %vm4289_vm1, %v4288_v42 }
 0x4c3   :  { %v376_v20 = vmul.f32 %v4146_v18, %v4142_v6  ;;  %3816 = vmatprep.subr.mxu0 %v4288_v42 }
 0x4c5   :  { %3804 = vmatmul.mubr.msk.f32.vlgmr.msra.gmra.mrb[6].mxu1 %vm201_vm2, %v376_v20  ;;  %3809 = vmatmul.mubr.msk.f32.vlgmr.msra.gmra.mrb[2].mxu0 %vm201_vm2, %v530_v21 }
 0x4c6   :  { %3812 = vmatpush3.xpose.msk.msra.mxu1 %vm201_vm2, %v610_v9  ;;  %3813 = vmatprep.mubr.msk.f32.mxu1 %vm4289_vm1, %v4288_v42 }
 0x4c7   :  { %3821 = vmatprep.subr.mxu1 %v4288_v42  ;;  %3818 = vmatprep.mubr.msk.f32.mxu0 %vm4289_vm1, %v4288_v42 }
 0x4c9   :  { %3814 = vmatmul.mubr.msk.f32.vlgmr.msra.gmra.mrb[8].mxu1 %vm201_vm2, %v608_v22 }
 0x4ca   :  { %3823 = vmatprep.mubr.msk.f32.mxu1 %vm4289_vm1, %v4288_v42 }
 0x594   :  { %v4501_v23 = vpop.f32.mrb[0].mxu0 }
 0x595   :  { %v3800_v24 = vpop.f32.mrb[1].mxu0 }
 0x598   :  { %v4503_v25 = vpop.f32.mrb[6].mxu1  ;;  %v603_v26 = vpop.f32.mrb[2].mxu0 }
 0x599   :  { %v685_v28 = vmul.f32 0.17677669, %v603_v26  ;;  %v3805_v29 = vpop.f32.mrb[7].mxu1  ;;  %v3810_v31 = vpop.f32.mrb[3].mxu0 }
 0x59b   :  { %v687_v32 = vsel %vm201_vm2, %v685_v28, -inf }
 0x59c   :  { %688 = vmax.xlane.f32.xlu0 %v687_v32  ;;  %v681_v33 = vpop.f32.mrb[8].mxu1 }
 0x59d   :  { %v686_v34 = vmul.f32 0.17677669, %v681_v33  ;;  %v3815_v35 = vpop.f32.mrb[9].mxu1 }
 0x59f   :  { %v690_v36 = vsel %vm201_vm2, %v686_v34, -inf }
 0x5a0   :  { %691 = vmax.xlane.f32.xlu1 %v690_v36 }
 0x5b1   :  { %785 = vrot.lane.b32.xlu1 %v4448_v45, %s4294_s30 }
 0x5b2   :  { %709 = vrot.lane.b32.xlu0 %v4451_v47, %s4294_s30 }
 0x5b5   :  { %863 = vrot.lane.b32.xlu1 %v4451_v47, %s4295_s11 }
 0x5b9   :  { %941 = vrot.lane.b32.xlu1 %v4448_v45, %s4295_s11 }
 0x5bd   :  { %939 = vrot.lane.b32.xlu1 %v4448_v45, %s4296_s12 }
 0x629   :  { %v689_v37 = vpop.xlane.xlu0 %688 }
 0x62a   :  { %v693_v38 = vsub.f32 %v685_v28, %v689_v37 }
 0x62c   :  { %v695_v39 = vmul.f32 1.442695, %v693_v38 }
 0x62d   :  { %v710_v40 = vpop.permute.xlu0 %709  ;;  %v692_v41 = vpop.xlane.xlu1 %691 }
 0x62e   :  { %4147 = vpow2.f32 %v695_v39  ;;  %v694_v44 = vsub.f32 %v686_v34, %v692_v41  ;;  %3817 = vmatpush3.msra.mxu0 %v710_v40 }
 0x62f   :  { %3826 = vmatprep.subr.mxu0 %v4288_v42 }
 0x630   :  { %v697_v46 = vmul.f32 1.442695, %v694_v44 }
 0x631   :  { %v786_v48 = vpop.permute.xlu1 %785 }
 0x632   :  { %4149 = vpow2.f32 %v697_v46  ;;  %3822 = vmatpush3.msra.mxu1 %v786_v48 }
 0x633   :  { %3831 = vmatprep.subr.mxu1 %v4288_v42 }
 0x635   :  { %v864_v55 = vpop.permute.xlu1 %863 }
 0x638   :  { %v4148_v49 = vpop.eup %4147 }
 0x639   :  { %v699_v50 = vsel %vm201_vm2, %v4148_v49, 0.0  ;;  %v942_v59 = vpop.permute.xlu1 %941 }
 0x63a   :  { %700 = vadd.xlane.f32.xlu0 %v699_v50 }
 0x63c   :  { %v4150_v51 = vpop.eup %4149 }
 0x63d   :  { %v702_v52 = vsel %vm201_vm2, %v4150_v51, 0.0  ;;  %v940_v62 = vpop.permute.xlu1 %939 }
 0x63e   :  { %703 = vadd.xlane.f32.xlu0 %v702_v52 }
 0x654   :  { %861 = vrot.lane.b32.xlu0 %v4451_v47, %s4296_s12 }
 0x6c7   :  { %v701_v53 = vpop.xlane.xlu0 %700 }
 0x6c8   :  { %4151 = vrcp.f32 %v701_v53 }
 0x6cb   :  { %v704_v54 = vpop.xlane.xlu0 %703 }
 0x6cc   :  { %4153 = vrcp.f32 %v704_v54 }
 0x6cf   :  { %v862_v61 = vpop.permute.xlu0 %861 }
 0x6d2   :  { %v4152_v56 = vpop.eup %4151 }
 0x6d3   :  { %v707_v57 = vmul.f32 %v4152_v56, %v4148_v49 }
 0x6d5   :  { %3819 = vmatmul.mubr.msk.f32.vlgmr.msra.gmra.mrb[4].mxu0 %vm201_vm2, %v707_v57 }
 0x6d6   :  { %v4154_v58 = vpop.eup %4153  ;;  %3827 = vmatpush3.xpose.msk.msra.mxu0 %vm201_vm2, %v864_v55  ;;  %3828 = vmatprep.mubr.msk.f32.mxu0 %vm4289_vm1, %v4288_v42 }
 0x6d7   :  { %v708_v60 = vmul.f32 %v4154_v58, %v4150_v51  ;;  %3836 = vmatprep.subr.mxu0 %v4288_v42 }
 0x6d9   :  { %3824 = vmatmul.mubr.msk.f32.vlgmr.msra.gmra.mrb[10].mxu1 %vm201_vm2, %v708_v60  ;;  %3829 = vmatmul.mubr.msk.f32.vlgmr.msra.gmra.mrb[6].mxu0 %vm201_vm2, %v862_v61  ;;  %v4110_v60 = vpack.i.bf16 %v4419_v19, %v4410_v16 }
 0x6da   :  { %3832 = vmatpush3.xpose.msk.msra.mxu1 %vm201_vm2, %v942_v59  ;;  %3833 = vmatprep.mubr.msk.f32.mxu1 %vm4289_vm1, %v4288_v42 }
 0x6db   :  { %3841 = vmatprep.subr.mxu1 %v4288_v42  ;;  %3838 = vmatprep.mubr.msk.f32.mxu0 %vm4289_vm1, %v4288_v42 }
 0x6dd   :  { %3834 = vmatmul.mubr.msk.f32.vlgmr.msra.gmra.mrb[12].mxu1 %vm201_vm2, %v940_v62 }
 0x6de   :  { %3843 = vmatprep.mubr.msk.f32.mxu1 %vm4289_vm1, %v4288_v42 }
 0x7a8   :  { %v4537_v63 = vpop.f32.mrb[4].mxu0 }
 0x7a9   :  { %v3820_v2 = vpop.f32.mrb[5].mxu0 }
 0x7ac   :  { %v4539_v3 = vpop.f32.mrb[10].mxu1  ;;  %v935_v4 = vpop.f32.mrb[6].mxu0 }
 0x7ad   :  { %v1017_v5 = vmul.f32 0.17677669, %v935_v4  ;;  %v3825_v6 = vpop.f32.mrb[11].mxu1  ;;  %v3830_v7 = vpop.f32.mrb[7].mxu0 }
 0x7af   :  { %v1019_v8 = vsel %vm201_vm2, %v1017_v5, -inf }
 0x7b0   :  { %1020 = vmax.xlane.f32.xlu0 %v1019_v8  ;;  %v1013_v9 = vpop.f32.mrb[12].mxu1 }
 0x7b1   :  { %v1018_v10 = vmul.f32 0.17677669, %v1013_v9  ;;  %v3835_v11 = vpop.f32.mrb[13].mxu1 }
 0x7b3   :  { %v1022_v12 = vsel %vm201_vm2, %v1018_v10, -inf }
 0x7b4   :  { %1023 = vmax.xlane.f32.xlu1 %v1022_v12 }
 0x7c5   :  { %1117 = vrot.lane.b32.xlu1 %v4448_v45, %s4297_s0 }
 0x7c6   :  { %1041 = vrot.lane.b32.xlu0 %v4451_v47, %s4297_s0 }
 0x7c9   :  { %1195 = vrot.lane.b32.xlu1 %v4451_v47, %s4298_s10 }
 0x7cd   :  { %1273 = vrot.lane.b32.xlu1 %v4448_v45, %s4298_s10 }
 0x7d1   :  { %1271 = vrot.lane.b32.xlu1 %v4448_v45, %s4299_s1 }
 0x83d   :  { %v1021_v13 = vpop.xlane.xlu0 %1020 }
 0x83e   :  { %v1025_v18 = vsub.f32 %v1017_v5, %v1021_v13 }
 0x840   :  { %v1027_v20 = vmul.f32 1.442695, %v1025_v18 }
 0x841   :  { %v1042_v21 = vpop.permute.xlu0 %1041  ;;  %v1024_v22 = vpop.xlane.xlu1 %1023 }
 0x842   :  { %4155 = vpow2.f32 %v1027_v20  ;;  %v1026_v24 = vsub.f32 %v1018_v10, %v1024_v22  ;;  %3837 = vmatpush3.msra.mxu0 %v1042_v21 }
 0x843   :  { %3846 = vmatprep.subr.mxu0 %v4288_v42 }
 0x844   :  { %v1029_v26 = vmul.f32 1.442695, %v1026_v24 }
 0x845   :  { %v1118_v28 = vpop.permute.xlu1 %1117 }
 0x846   :  { %4157 = vpow2.f32 %v1029_v26  ;;  %3842 = vmatpush3.msra.mxu1 %v1118_v28 }
 0x847   :  { %3851 = vmatprep.subr.mxu1 %v4288_v42 }
 0x849   :  { %v1196_v36 = vpop.permute.xlu1 %1195 }
 0x84c   :  { %v4156_v29 = vpop.eup %4155 }
 0x84d   :  { %v1031_v31 = vsel %vm201_vm2, %v4156_v29, 0.0  ;;  %v1274_v40 = vpop.permute.xlu1 %1273 }
 0x84e   :  { %1032 = vadd.xlane.f32.xlu0 %v1031_v31 }
 0x850   :  { %v4158_v32 = vpop.eup %4157 }
 0x851   :  { %v1034_v33 = vsel %vm201_vm2, %v4158_v32, 0.0  ;;  %v1272_v46 = vpop.permute.xlu1 %1271 }
 0x852   :  { %1035 = vadd.xlane.f32.xlu0 %v1034_v33 }
 0x868   :  { %1193 = vrot.lane.b32.xlu0 %v4451_v47, %s4299_s1 }
 0x8db   :  { %v1033_v34 = vpop.xlane.xlu0 %1032 }
 0x8dc   :  { %4159 = vrcp.f32 %v1033_v34 }
 0x8df   :  { %v1036_v35 = vpop.xlane.xlu0 %1035 }
 0x8e0   :  { %4161 = vrcp.f32 %v1036_v35 }
 0x8e3   :  { %v1194_v44 = vpop.permute.xlu0 %1193 }
 0x8e6   :  { %v4160_v37 = vpop.eup %4159 }
 0x8e7   :  { %v1039_v38 = vmul.f32 %v4160_v37, %v4156_v29 }
 0x8e9   :  { %3839 = vmatmul.mubr.msk.f32.vlgmr.msra.gmra.mrb[8].mxu0 %vm201_vm2, %v1039_v38 }
 0x8ea   :  { %v4162_v39 = vpop.eup %4161  ;;  %3847 = vmatpush3.xpose.msk.msra.mxu0 %vm201_vm2, %v1196_v36  ;;  %3848 = vmatprep.mubr.msk.f32.mxu0 %vm4289_vm1, %v4288_v42 }
 0x8eb   :  { %v1040_v41 = vmul.f32 %v4162_v39, %v4158_v32  ;;  %3856 = vmatprep.subr.mxu0 %v4288_v42 }
 0x8ed   :  { %3844 = vmatmul.mubr.msk.f32.vlgmr.msra.gmra.mrb[14].mxu1 %vm201_vm2, %v1040_v41  ;;  %3849 = vmatmul.mubr.msk.f32.vlgmr.msra.gmra.mrb[10].mxu0 %vm201_vm2, %v1194_v44 }
 0x8ee   :  { %3852 = vmatpush3.xpose.msk.msra.mxu1 %vm201_vm2, %v1274_v40  ;;  %3853 = vmatprep.mubr.msk.f32.mxu1 %vm4289_vm1, %v4288_v42 }
 0x8ef   :  { %3861 = vmatprep.subr.mxu1 %v4288_v42  ;;  %3858 = vmatprep.mubr.msk.f32.mxu0 %vm4289_vm1, %v4288_v42 }
 0x8f1   :  { %3854 = vmatmul.mubr.msk.f32.vlgmr.msra.gmra.mrb[16].mxu1 %vm201_vm2, %v1272_v46 }
 0x8f2   :  { %3863 = vmatprep.mubr.msk.f32.mxu1 %vm4289_vm1, %v4288_v42 }
 0x9bc   :  { %v1113_v48 = vpop.f32.mrb[8].mxu0 }
 0x9bd   :  { %v3840_v49 = vpop.f32.mrb[9].mxu0 }
 0x9c0   :  { %v1189_v50 = vpop.f32.mrb[14].mxu1  ;;  %v1267_v51 = vpop.f32.mrb[10].mxu0 }
 0x9c1   :  { %v1349_v52 = vmul.f32 0.17677669, %v1267_v51  ;;  %v3845_v53 = vpop.f32.mrb[15].mxu1  ;;  %v3850_v54 = vpop.f32.mrb[11].mxu0 }
 0x9c2   :  { %v3623_v53 = vld [vmem:[%s4916_s3 + $0x20] sm:$0xff] }
 0x9c3   :  { %v1351_v55 = vsel %vm201_vm2, %v1349_v52, -inf }
 0x9c4   :  { %1352 = vmax.xlane.f32.xlu0 %v1351_v55  ;;  %v1345_v56 = vpop.f32.mrb[16].mxu1 }
 0x9c5   :  { %v1350_v57 = vmul.f32 0.17677669, %v1345_v56  ;;  %v3855_v58 = vpop.f32.mrb[17].mxu1 }
 0x9c7   :  { %v1354_v59 = vsel %vm201_vm2, %v1350_v57, -inf }
 0x9c8   :  { %1355 = vmax.xlane.f32.xlu1 %v1354_v59 }
 0x9d9   :  { %1449 = vrot.lane.b32.xlu1 %v4448_v45, %s4300_s13 }
 0x9dd   :  { %4106 = vrot.lane.b32.xlu1 %v4105_v17, %s4301_s14 }
 0x9e1   :  { %4111 = vrot.lane.b32.xlu1 %v4110_v60, %s4301_s14 }
 0x9e5   :  { %1529 = vrot.lane.b32.xlu1 %v4539_v3, %s4286_s20 }
 0x9e9   :  { %1537 = vrot.lane.b32.xlu1 %v1189_v50, %s4302_s15 }
 0xa51   :  { %v1353_v61 = vpop.xlane.xlu0 %1352 }
 0xa52   :  { %v1357_v62 = vsub.f32 %v1349_v52, %v1353_v61 }
 0xa54   :  { %v1359_v45 = vmul.f32 1.442695, %v1357_v62 }
 0xa55   :  { %v1356_v2 = vpop.xlane.xlu1 %1355 }
 0xa56   :  { %4163 = vpow2.f32 %v1359_v45  ;;  %v1358_v4 = vsub.f32 %v1350_v57, %v1356_v2  ;;  %v3625_v2 = vld [vmem:[%s4916_s3 + $0x30] sm:$0xff] }
 0xa58   :  { %v1361_v5 = vmul.f32 1.442695, %v1358_v4  ;;  %v3626_v4 = vld [vmem:[%s4916_s3 + $0x38] sm:$0xff] }
 0xa59   :  { %v1450_v14 = vpop.permute.xlu1 %1449 }
 0xa5a   :  { %4165 = vpow2.f32 %v1361_v5  ;;  %3862 = vmatpush3.msra.mxu1 %v1450_v14  ;;  %v4638_v5 = vpack.i.bf16 %v3626_v4, %v3625_v2 }
 0xa5d   :  { %v4107_v6 = vpop.permute.xlu1 %4106 }
 0xa5e   :  { %v4109_v7 = vunpack.i.h.bf16 %v4107_v6  ;;  %v4108_v8 = vunpack.i.l.bf16 %v4107_v6  ;;  %v4040_v6 = vpack.c.bf16 %v3626_v4, %v3625_v2 }
 0xa60   :  { %v4164_v15 = vpop.eup %4163  ;;  %v4028_v10 = vpack.c.bf16 %v4109_v7, %v4108_v8  ;;  %v4647_v7 = vld [vmem:[%s4917_s4 + $0x1] ss:$0 sm:$0xff] }
 0xa61   :  { %v1363_v16 = vsel %vm201_vm2, %v4164_v15, 0.0  ;;  %v4112_v11 = vpop.permute.xlu1 %4111 }
 0xa62   :  { %1364 = vadd.xlane.f32.xlu0 %v1363_v16  ;;  %v4114_v12 = vunpack.i.h.bf16 %v4112_v11  ;;  %v4113_v13 = vunpack.i.l.bf16 %v4112_v11 }
 0xa64   :  { %v4166_v17 = vpop.eup %4165  ;;  %v4032_v20 = vpack.c.bf16 %v4114_v12, %v4113_v13 }
 0xa65   :  { %v1366_v19 = vsel %vm201_vm2, %v4166_v17, 0.0  ;;  %v1530_v32 = vpop.permute.xlu1 %1529 }
 0xa66   :  { %1367 = vadd.xlane.f32.xlu0 %v1366_v19  ;;  %v1550_v39 = vsel %vm201_vm2, %v4503_v25, %v1530_v32 }
 0xa69   :  { %v1538_v35 = vpop.permute.xlu1 %1537 }
 0xa7c   :  { %1373 = vrot.lane.b32.xlu0 %v4451_v47, %s4300_s13 }
 0xa80   :  { %1527 = vrot.lane.b32.xlu0 %v4537_v63, %s4286_s20 }
 0xa84   :  { %1535 = vrot.lane.b32.xlu0 %v1113_v48, %s4302_s15 }
 0xaef   :  { %v1365_v3 = vpop.xlane.xlu0 %1364 }
 0xaf0   :  { %4167 = vrcp.f32 %v1365_v3  ;;  %v63_v3 = vld [vmem:[#allocation5] sm:$0xff] }
 0xaf3   :  { %v1368_v9 = vpop.xlane.xlu0 %1367 }
 0xaf4   :  { %4169 = vrcp.f32 %v1368_v9 }
 0xaf7   :  { %v1374_v18 = vpop.permute.xlu0 %1373 }
 0xaf8   :  { %3857 = vmatpush3.msra.mxu0 %v1374_v18 }
 0xaf9   :  { %4029 = vmatprep.subr.bf16.mxu0 %v4028_v10 }
 0xafa   :  { %v4168_v47 = vpop.eup %4167 }
 0xafb   :  { %v1371_v21 = vmul.f32 %v4168_v47, %v4164_v15  ;;  %v1528_v31 = vpop.permute.xlu0 %1527 }
 0xafc   :  { %v1549_v34 = vsel %vm201_vm2, %v4501_v23, %v1528_v31 }
 0xafd   :  { %3859 = vmatmul.mubr.msk.f32.vlgmr.msra.gmra.mrb[12].mxu0 %vm201_vm2, %v1371_v21 }
 0xafe   :  { %v4170_v63 = vpop.eup %4169  ;;  %4031 = vmatpush3.bf16.msra.mxu0 %v4028_v10 }
 0xaff   :  { %v1372_v22 = vmul.f32 %v4170_v63, %v4166_v17  ;;  %4033 = vmatprep.subr.bf16.mxu0 %v4032_v20  ;;  %v1536_v33 = vpop.permute.xlu0 %1535  ;;  %v1687_v63 = vsub.s32 2, %v4423_v27 }
 0xb00   :  { %v1552_v36 = vsel %vm1551_vm4, %v1549_v34, %v1536_v33 }
 0xb01   :  { %3864 = vmatmul.mubr.msk.f32.vlgmr.msra.gmra.mrb[18].mxu1 %vm201_vm2, %v1372_v22  ;;  %v64_v22 = vld [vmem:[#allocation5 + $0x8] sm:$0xff] }
 0xb02   :  { %4035 = vmatpush3.bf16.msra.mxu0 %v4032_v20 }
 0xbd0   :  { %v1445_v24 = vpop.f32.mrb[12].mxu0 }
 0xbd1   :  { %1543 = vrot.lane.b32.xlu0 %v1445_v24, %s4303_s16  ;;  %v3860_v26 = vpop.f32.mrb[13].mxu0 }
 0xbd4   :  { %v1521_v28 = vpop.f32.mrb[18].mxu1 }
 0xbd5   :  { %1545 = vrot.lane.b32.xlu1 %v1521_v28, %s4303_s16  ;;  %v3865_v29 = vpop.f32.mrb[19].mxu1  ;;  %1573 = vrot.lane.b32.xlu0 %v4445_v43, %s4301_s14  ;;  %v1553_v43 = vsel %vm1551_vm4, %v1550_v39, %v1538_v35  ;;  %v1688_v28 = vrot.slane %v4429_v30, %v1687_v63 }
 0xbd6   :  { %v1693_v29 = vsub.s32 3, %v4423_v27 }
 0xbd8   :  { %v1694_v34 = vrot.slane %v4429_v30, %v1693_v29 }
 0xc43   :  { %v1544_v37 = vpop.permute.xlu0 %1543 }
 0xc44   :  { %v1555_v38 = vsel %vm1554_vm3, %v1552_v36, %v1544_v37 }
 0xc45   :  { %3874 = vmatprep.mubr.msk.f32.mxu0 %vm66_vm0, %v1555_v38 }
 0xc47   :  { %v1546_v40 = vpop.permute.xlu1 %1545  ;;  %v1574_v44 = vpop.permute.xlu0 %1573 }
 0xc48   :  { %v1556_v41 = vsel %vm1554_vm3, %v1553_v43, %v1546_v40 }
 0xc49   :  { %3875 = vmatmul.mubr.msk.f32.vlgmr.msra.gmra.mrb[14].mxu0 %vm66_vm0, %v1556_v41 }
 0xc4a   :  { %3896 = vmatprep.mubr.msk.f32.mxu0 %vm66_vm0, %v63_v3 }
 0xd1c   :  { %v3876_v23 = vpop.f32.mrb[14].mxu0 }
 0xd1d   :  { %v1654_v46 = vadd.f32 %v3876_v23, %v1574_v44  ;;  %v1648_v48 = vpop.f32.mrb[15].mxu0 }
 0xd1e   :  { %v1649_v49 = vadd.f32 %v1648_v48, %v1574_v44 }
 0xd1f   :  { %v4609_v50 = vadd.f32 %v1654_v46, %v4387_v1  ;;  %v3624_v1 = vld [vmem:[%s4916_s3 + $0x28] sm:$0xff] }
 0xd20   :  { %v4612_v51 = vadd.f32 %v1649_v49, %v4385_v0  ;;  %v4624_v54 = vpack.i.bf16 %v3624_v1, %v3623_v53  ;;  %v4036_v19 = vpack.c.bf16 %v3624_v1, %v3623_v53 }
 0xd21   :  { %v1662_v25 = vsel %vm66_vm0, %v4609_v50, 0.0 }
 0xd22   :  { %1663 = vadd.xlane.f32.xlu0 %v1662_v25  ;;  %v1659_v52 = vsel %vm66_vm0, %v4612_v51, 0.0  ;;  %4037 = vmatprep.subr.bf16.mxu1 %v4036_v19 }
 0xd23   :  { %1660 = vadd.xlane.f32.xlu1 %v1659_v52  ;;  %4039 = vmatpush3.bf16.msra.mxu1 %v4036_v19 }
 0xd24   :  { %4041 = vmatprep.subr.bf16.mxu1 %v4040_v6 }
 0xd27   :  { %4043 = vmatpush3.bf16.msra.mxu1 %v4040_v6 }
 0xd28   :  { %3899 = vmatprep.subr.mxu1 %v4288_v42 }
 0xd34   :  { %4116 = vrot.lane.b32.xlu1 %v4624_v54, %s4290_s26 }
 0xd38   :  { %1807 = vrot.lane.b32.xlu1 %v4647_v7, %s4290_s26 }
 0xdaf   :  { %v1664_v0 = vpop.xlane.xlu0 %1663 }
 0xdb0   :  { %v1666_v55 = vmul.f32 0.03125, %v1664_v0  ;;  %v1661_v56 = vpop.xlane.xlu1 %1660 }
 0xdb1   :  { %v1665_v57 = vmul.f32 0.03125, %v1661_v56 }
 0xdb2   :  { %v1668_v58 = vsub.f32 %v4609_v50, %v1666_v55 }
 0xdb3   :  { %v1667_v59 = vsub.f32 %v4612_v51, %v1665_v57 }
 0xdb4   :  { %v1670_v60 = vmul.f32 %v1668_v58, %v1668_v58  ;;  %v4117_v14 = vpop.permute.xlu1 %4116 }
 0xdb5   :  { %v1669_v62 = vmul.f32 %v1667_v59, %v1667_v59  ;;  %v4119_v15 = vunpack.i.h.bf16 %v4117_v14  ;;  %v4118_v16 = vunpack.i.l.bf16 %v4117_v14 }
 0xdb6   :  { %v1674_v61 = vsel %vm66_vm0, %v1670_v60, 0.0 }
 0xdb7   :  { %1675 = vadd.xlane.f32.xlu0 %v1674_v61  ;;  %v1671_v45 = vsel %vm66_vm0, %v1669_v62, 0.0  ;;  %v4044_v17 = vpack.c.bf16 %v4119_v15, %v4118_v16 }
 0xdb8   :  { %v1808_v38 = vpop.permute.xlu1 %1807 }
 0xdb9   :  { %4045 = vmatprep.subr.bf16.mxu0 %v4044_v17 }
 0xdba   :  { %4047 = vmatpush3.bf16.msra.mxu0 %v4044_v17 }
 0xdbb   :  { %1672 = vadd.xlane.f32.xlu0 %v1671_v45 }
 0xdd1   :  { %4121 = vrot.lane.b32.xlu0 %v4638_v5, %s4290_s26 }
 0xe44   :  { %v1676_v8 = vpop.xlane.xlu0 %1675 }
 0xe45   :  { %v1678_v9 = vmul.f32 0.03125, %v1676_v8 }
 0xe47   :  { %v1680_v10 = vadd.f32 1e-06, %v1678_v9 }
 0xe48   :  { %v1673_v11 = vpop.xlane.xlu0 %1672 }
 0xe49   :  { %4171 = vrsqrt.f32 %v1680_v10  ;;  %v1677_v12 = vmul.f32 0.03125, %v1673_v11 }
 0xe4b   :  { %v1679_v13 = vadd.f32 1e-06, %v1677_v12 }
 0xe4c   :  { %v4122_v18 = vpop.permute.xlu0 %4121 }
 0xe4d   :  { %4173 = vrsqrt.f32 %v1679_v13  ;;  %v4124_v47 = vunpack.i.h.bf16 %v4122_v18  ;;  %v4123_v20 = vunpack.i.l.bf16 %v4122_v18 }
 0xe4f   :  { %v4048_v21 = vpack.c.bf16 %v4124_v47, %v4123_v20 }
 0xe51   :  { %4049 = vmatprep.subr.bf16.mxu0 %v4048_v21 }
 0xe52   :  { %4051 = vmatpush3.bf16.msra.mxu0 %v4048_v21 }
 0xe53   :  { %v4172_v24 = vpop.eup %4171  ;;  %3909 = vmatprep.subr.mxu0 %v4288_v42 }
 0xe54   :  { %v1684_v26 = vmul.f32 %v4172_v24, %v1668_v58 }
 0xe55   :  { %3897 = vmatmul.mubr.msk.f32.vlgmr.msra.gmra.mrb[16].mxu0 %vm66_vm0, %v64_v22 }
 0xe56   :  { %3911 = vmatprep.mubr.msk.f32.mxu0 %vm4289_vm1, %v4288_v42  ;;  %v1690_v33 = vmul.f32 %v1688_v28, %v1684_v26 }
 0xe57   :  { %v4174_v31 = vpop.eup %4173 }
 0xe58   :  { %v1683_v32 = vmul.f32 %v4174_v31, %v1667_v59  ;;  %v1696_v37 = vadd.f32 %v1694_v34, %v1690_v33 }
 0xe5a   :  { %v1689_v35 = vmul.f32 %v1688_v28, %v1683_v32 }
 0xe5c   :  { %v1695_v36 = vadd.f32 %v1694_v34, %v1689_v35 }
 0xe5e   :  { %3885 = vmatprep.mubr.msk.f32.mxu1 %vm66_vm0, %v1695_v36 }
 0xe5f   :  { %3886 = vmatmul.mubr.msk.f32.vlgmr.msra.gmra.mrb[20].mxu1 %vm66_vm0, %v1696_v37 }
 0xe60   :  { %3901 = vmatprep.mubr.msk.f32.mxu1 %vm4289_vm1, %v4288_v42 }
 0xf28   :  { %v3898_v39 = vpop.f32.mrb[16].mxu0 }
 0xf29   :  { %v1882_v43 = vpop.f32.mrb[17].mxu0  ;;  %v4671_v23 = vadd.f32 %v3898_v39, %v1808_v38 }
 0xf2a   :  { %v4663_v40 = vadd.f32 %v1882_v43, %v1808_v38 }
 0xf2c   :  { %3900 = vmatpush3.xpose.msk.msra.mxu1 %vm201_vm2, %v4663_v40 }
 0xf2d   :  { %3904 = vmatprep.subr.mxu1 %v4288_v42 }
 0xf32   :  { %v3887_v30 = vpop.f32.mrb[20].mxu1 }
 0xf33   :  { %v1782_v41 = vpop.f32.mrb[21].mxu1  ;;  %v4680_v46 = vadd.f32 %v3887_v30, %v4647_v7 }
 0xf34   :  { %v4669_v44 = vadd.f32 %v4647_v7, %v1782_v41 }
 0xf36   :  { %3902 = vmatmul.mubr.msk.f32.vlgmr.msra.gmra.mrb[22].mxu1 %vm201_vm2, %v4669_v44 }
 0xf37   :  { %3905 = vmatpush3.xpose.msk.msra.mxu1 %vm201_vm2, %v4671_v23  ;;  %3906 = vmatprep.mubr.msk.f32.mxu1 %vm4289_vm1, %v4288_v42 }
 0xf38   :  { %3914 = vmatprep.subr.mxu1 %v4288_v42 }
 0xf3a   :  { %3907 = vmatmul.mubr.msk.f32.vlgmr.msra.gmra.mrb[24].mxu1 %vm201_vm2, %v4680_v46 }
 0xf3b   :  { %3916 = vmatprep.mubr.msk.f32.mxu1 %vm4289_vm1, %v4288_v42 }
0x1009   :  { %v1963_v48 = vpop.f32.mrb[22].mxu1 }
0x100a   :  { %v2043_v49 = vmul.f32 0.17677669, %v1963_v48  ;;  %v3903_v25 = vpop.f32.mrb[23].mxu1 }
0x100c   :  { %v2045_v52 = vsel %vm201_vm2, %v2043_v49, -inf }
0x100d   :  { %2046 = vmax.xlane.f32.xlu1 %v2045_v52  ;;  %v2039_v53 = vpop.f32.mrb[24].mxu1 }
0x100e   :  { %v2044_v1 = vmul.f32 0.17677669, %v2039_v53  ;;  %v3908_v0 = vpop.f32.mrb[25].mxu1 }
0x1010   :  { %v2048_v55 = vsel %vm201_vm2, %v2044_v1, -inf }
0x1011   :  { %2049 = vmax.xlane.f32.xlu0 %v2048_v55 }
0x101e   :  { %2143 = vrot.lane.b32.xlu1 %v4671_v23, %s4290_s26 }
0x1022   :  { %2221 = vrot.lane.b32.xlu1 %v4663_v40, %s4293_s29 }
0x1026   :  { %2299 = vrot.lane.b32.xlu1 %v4671_v23, %s4293_s29 }
0x1027   :  { %2067 = vrot.lane.b32.xlu0 %v4663_v40, %s4290_s26 }
0x109a   :  { %v2047_v56 = vpop.xlane.xlu1 %2046 }
0x109b   :  { %v2051_v57 = vsub.f32 %v2043_v49, %v2047_v56 }
0x109d   :  { %v2053_v58 = vmul.f32 1.442695, %v2051_v57 }
0x109e   :  { %v2144_v59 = vpop.permute.xlu1 %2143  ;;  %v2050_v60 = vpop.xlane.xlu0 %2049 }
0x109f   :  { %4175 = vpow2.f32 %v2053_v58  ;;  %v2052_v61 = vsub.f32 %v2044_v1, %v2050_v60  ;;  %3915 = vmatpush3.msra.mxu1 %v2144_v59 }
0x10a0   :  { %3924 = vmatprep.subr.mxu1 %v4288_v42 }
0x10a1   :  { %v2055_v62 = vmul.f32 1.442695, %v2052_v61 }
0x10a2   :  { %v2068_v45 = vpop.permute.xlu0 %2067  ;;  %v2222_v16 = vpop.permute.xlu1 %2221 }
0x10a3   :  { %4177 = vpow2.f32 %v2055_v62  ;;  %3910 = vmatpush3.msra.mxu0 %v2068_v45 }
0x10a4   :  { %3919 = vmatprep.subr.mxu0 %v4288_v42 }
0x10a6   :  { %v2300_v17 = vpop.permute.xlu1 %2299 }
0x10a9   :  { %v4176_v2 = vpop.eup %4175 }
0x10aa   :  { %v2057_v4 = vsel %vm201_vm2, %v4176_v2, 0.0 }
0x10ab   :  { %2058 = vadd.xlane.f32.xlu0 %v2057_v4 }
0x10ad   :  { %v4178_v14 = vpop.eup %4177 }
0x10ae   :  { %v2060_v15 = vsel %vm201_vm2, %v4178_v14, 0.0 }
0x10af   :  { %2061 = vadd.xlane.f32.xlu1 %v2060_v15 }
0x10c0   :  { %2297 = vrot.lane.b32.xlu1 %v4680_v46, %s4293_s29 }
0x10c1   :  { %2219 = vrot.lane.b32.xlu0 %v4669_v44, %s4293_s29 }
0x1138   :  { %v2059_v19 = vpop.xlane.xlu0 %2058 }
0x1139   :  { %4179 = vrcp.f32 %v2059_v19 }
0x113c   :  { %v2062_v3 = vpop.xlane.xlu1 %2061  ;;  %v2220_v11 = vpop.permute.xlu0 %2219 }
0x113d   :  { %4181 = vrcp.f32 %v2062_v3 }
0x1140   :  { %v2298_v12 = vpop.permute.xlu1 %2297 }
0x1143   :  { %v4180_v6 = vpop.eup %4179 }
0x1144   :  { %v2065_v8 = vmul.f32 %v4180_v6, %v4176_v2 }
0x1146   :  { %3912 = vmatmul.mubr.msk.f32.vlgmr.msra.gmra.mrb[18].mxu0 %vm201_vm2, %v2065_v8 }
0x1147   :  { %v4182_v9 = vpop.eup %4181  ;;  %3920 = vmatpush3.xpose.msk.msra.mxu0 %vm201_vm2, %v2222_v16  ;;  %3921 = vmatprep.mubr.msk.f32.mxu0 %vm4289_vm1, %v4288_v42 }
0x1148   :  { %v2066_v10 = vmul.f32 %v4182_v9, %v4178_v14  ;;  %3929 = vmatprep.subr.mxu0 %v4288_v42 }
0x114a   :  { %3917 = vmatmul.mubr.msk.f32.vlgmr.msra.gmra.mrb[26].mxu1 %vm201_vm2, %v2066_v10  ;;  %3922 = vmatmul.mubr.msk.f32.vlgmr.msra.gmra.mrb[20].mxu0 %vm201_vm2, %v2220_v11 }
0x114b   :  { %3925 = vmatpush3.xpose.msk.msra.mxu1 %vm201_vm2, %v2300_v17  ;;  %3926 = vmatprep.mubr.msk.f32.mxu1 %vm4289_vm1, %v4288_v42 }
0x114c   :  { %3934 = vmatprep.subr.mxu1 %v4288_v42  ;;  %3931 = vmatprep.mubr.msk.f32.mxu0 %vm4289_vm1, %v4288_v42 }
0x114e   :  { %3927 = vmatmul.mubr.msk.f32.vlgmr.msra.gmra.mrb[28].mxu1 %vm201_vm2, %v2298_v12 }
0x114f   :  { %3936 = vmatprep.mubr.msk.f32.mxu1 %vm4289_vm1, %v4288_v42 }
0x1219   :  { %v4721_v13 = vpop.f32.mrb[18].mxu0 }
0x121a   :  { %v3913_v18 = vpop.f32.mrb[19].mxu0 }
0x121d   :  { %v4723_v47 = vpop.f32.mrb[26].mxu1  ;;  %v2293_v20 = vpop.f32.mrb[20].mxu0 }
0x121e   :  { %v2375_v21 = vmul.f32 0.17677669, %v2293_v20  ;;  %v3918_v63 = vpop.f32.mrb[27].mxu1  ;;  %v3923_v22 = vpop.f32.mrb[21].mxu0 }
0x1220   :  { %v2377_v24 = vsel %vm201_vm2, %v2375_v21, -inf }
0x1221   :  { %2378 = vmax.xlane.f32.xlu0 %v2377_v24  ;;  %v2371_v26 = vpop.f32.mrb[28].mxu1 }
0x1222   :  { %v2376_v28 = vmul.f32 0.17677669, %v2371_v26  ;;  %v3928_v29 = vpop.f32.mrb[29].mxu1 }
0x1224   :  { %v2380_v31 = vsel %vm201_vm2, %v2376_v28, -inf }
0x1225   :  { %2381 = vmax.xlane.f32.xlu1 %v2380_v31 }
0x1236   :  { %2475 = vrot.lane.b32.xlu1 %v4671_v23, %s4292_s28 }
0x1237   :  { %2399 = vrot.lane.b32.xlu0 %v4663_v40, %s4292_s28 }
0x123a   :  { %2553 = vrot.lane.b32.xlu1 %v4663_v40, %s4296_s12 }
0x123e   :  { %2631 = vrot.lane.b32.xlu1 %v4671_v23, %s4296_s12 }
0x1242   :  { %2629 = vrot.lane.b32.xlu1 %v4680_v46, %s4296_s12 }
0x12ae   :  { %v2379_v32 = vpop.xlane.xlu0 %2378 }
0x12af   :  { %v2383_v33 = vsub.f32 %v2375_v21, %v2379_v32 }
0x12b1   :  { %v2385_v34 = vmul.f32 1.442695, %v2383_v33 }
0x12b2   :  { %v2400_v35 = vpop.permute.xlu0 %2399  ;;  %v2382_v36 = vpop.xlane.xlu1 %2381 }
0x12b3   :  { %4183 = vpow2.f32 %v2385_v34  ;;  %v2384_v37 = vsub.f32 %v2376_v28, %v2382_v36  ;;  %3930 = vmatpush3.msra.mxu0 %v2400_v35 }
0x12b4   :  { %3939 = vmatprep.subr.mxu0 %v4288_v42 }
0x12b5   :  { %v2387_v38 = vmul.f32 1.442695, %v2384_v37 }
0x12b6   :  { %v2476_v39 = vpop.permute.xlu1 %2475 }
0x12b7   :  { %4185 = vpow2.f32 %v2387_v38  ;;  %3935 = vmatpush3.msra.mxu1 %v2476_v39 }
0x12b8   :  { %3944 = vmatprep.subr.mxu1 %v4288_v42 }
0x12ba   :  { %v2554_v52 = vpop.permute.xlu1 %2553 }
0x12bd   :  { %v4184_v43 = vpop.eup %4183 }
0x12be   :  { %v2389_v30 = vsel %vm201_vm2, %v4184_v43, 0.0  ;;  %v2632_v55 = vpop.permute.xlu1 %2631 }
0x12bf   :  { %2390 = vadd.xlane.f32.xlu0 %v2389_v30 }
0x12c1   :  { %v4186_v41 = vpop.eup %4185 }
0x12c2   :  { %v2392_v48 = vsel %vm201_vm2, %v4186_v41, 0.0  ;;  %v2630_v58 = vpop.permute.xlu1 %2629 }
0x12c3   :  { %2393 = vadd.xlane.f32.xlu0 %v2392_v48 }
0x12d9   :  { %2551 = vrot.lane.b32.xlu0 %v4669_v44, %s4296_s12 }
0x134c   :  { %v2391_v49 = vpop.xlane.xlu0 %2390 }
0x134d   :  { %4187 = vrcp.f32 %v2391_v49 }
0x1350   :  { %v2394_v25 = vpop.xlane.xlu0 %2393 }
0x1351   :  { %4189 = vrcp.f32 %v2394_v25 }
0x1354   :  { %v2552_v57 = vpop.permute.xlu0 %2551 }
0x1357   :  { %v4188_v53 = vpop.eup %4187 }
0x1358   :  { %v2397_v1 = vmul.f32 %v4188_v53, %v4184_v43 }
0x135a   :  { %3932 = vmatmul.mubr.msk.f32.vlgmr.msra.gmra.mrb[22].mxu0 %vm201_vm2, %v2397_v1 }
0x135b   :  { %v4190_v0 = vpop.eup %4189  ;;  %3940 = vmatpush3.xpose.msk.msra.mxu0 %vm201_vm2, %v2554_v52  ;;  %3941 = vmatprep.mubr.msk.f32.mxu0 %vm4289_vm1, %v4288_v42 }
0x135c   :  { %v2398_v56 = vmul.f32 %v4190_v0, %v4186_v41  ;;  %3949 = vmatprep.subr.mxu0 %v4288_v42 }
0x135e   :  { %3937 = vmatmul.mubr.msk.f32.vlgmr.msra.gmra.mrb[30].mxu1 %vm201_vm2, %v2398_v56  ;;  %3942 = vmatmul.mubr.msk.f32.vlgmr.msra.gmra.mrb[24].mxu0 %vm201_vm2, %v2552_v57 }
0x135f   :  { %3945 = vmatpush3.xpose.msk.msra.mxu1 %vm201_vm2, %v2632_v55  ;;  %3946 = vmatprep.mubr.msk.f32.mxu1 %vm4289_vm1, %v4288_v42 }
0x1360   :  { %3954 = vmatprep.subr.mxu1 %v4288_v42  ;;  %3951 = vmatprep.mubr.msk.f32.mxu0 %vm4289_vm1, %v4288_v42 }
0x1362   :  { %3947 = vmatmul.mubr.msk.f32.vlgmr.msra.gmra.mrb[32].mxu1 %vm201_vm2, %v2630_v58 }
0x1363   :  { %3956 = vmatprep.mubr.msk.f32.mxu1 %vm4289_vm1, %v4288_v42 }
0x142d   :  { %v4759_v59 = vpop.f32.mrb[22].mxu0 }
0x142e   :  { %v3933_v60 = vpop.f32.mrb[23].mxu0 }
0x1431   :  { %v4761_v61 = vpop.f32.mrb[30].mxu1  ;;  %v2625_v62 = vpop.f32.mrb[24].mxu0 }
0x1432   :  { %v2707_v45 = vmul.f32 0.17677669, %v2625_v62  ;;  %v3938_v2 = vpop.f32.mrb[31].mxu1  ;;  %v3943_v4 = vpop.f32.mrb[25].mxu0 }
0x1434   :  { %v2709_v14 = vsel %vm201_vm2, %v2707_v45, -inf }
0x1435   :  { %2710 = vmax.xlane.f32.xlu0 %v2709_v14  ;;  %v2703_v15 = vpop.f32.mrb[32].mxu1 }
0x1436   :  { %v2708_v16 = vmul.f32 0.17677669, %v2703_v15  ;;  %v3948_v17 = vpop.f32.mrb[33].mxu1 }
0x1438   :  { %v2712_v19 = vsel %vm201_vm2, %v2708_v16, -inf }
0x1439   :  { %2713 = vmax.xlane.f32.xlu1 %v2712_v19 }
0x144a   :  { %2807 = vrot.lane.b32.xlu1 %v4671_v23, %s4295_s11 }
0x144b   :  { %2731 = vrot.lane.b32.xlu0 %v4663_v40, %s4295_s11 }
0x144e   :  { %2885 = vrot.lane.b32.xlu1 %v4663_v40, %s4299_s1 }
0x1452   :  { %2963 = vrot.lane.b32.xlu1 %v4671_v23, %s4299_s1 }
0x1456   :  { %2961 = vrot.lane.b32.xlu1 %v4680_v46, %s4299_s1 }
0x14c2   :  { %v2711_v3 = vpop.xlane.xlu0 %2710 }
0x14c3   :  { %v2715_v6 = vsub.f32 %v2707_v45, %v2711_v3 }
0x14c5   :  { %v2717_v8 = vmul.f32 1.442695, %v2715_v6 }
0x14c6   :  { %v2732_v9 = vpop.permute.xlu0 %2731  ;;  %v2714_v10 = vpop.xlane.xlu1 %2713 }
0x14c7   :  { %4191 = vpow2.f32 %v2717_v8  ;;  %v2716_v11 = vsub.f32 %v2708_v16, %v2714_v10  ;;  %3950 = vmatpush3.msra.mxu0 %v2732_v9 }
0x14c8   :  { %3959 = vmatprep.subr.mxu0 %v4288_v42 }
0x14c9   :  { %v2719_v12 = vmul.f32 1.442695, %v2716_v11 }
0x14ca   :  { %v2808_v18 = vpop.permute.xlu1 %2807 }
0x14cb   :  { %4193 = vpow2.f32 %v2719_v12  ;;  %3955 = vmatpush3.msra.mxu1 %v2808_v18 }
0x14cc   :  { %3964 = vmatprep.subr.mxu1 %v4288_v42 }
0x14ce   :  { %v2886_v26 = vpop.permute.xlu1 %2885 }
0x14d1   :  { %v4192_v20 = vpop.eup %4191 }
0x14d2   :  { %v2721_v21 = vsel %vm201_vm2, %v4192_v20, 0.0  ;;  %v2964_v32 = vpop.permute.xlu1 %2963 }
0x14d3   :  { %2722 = vadd.xlane.f32.xlu0 %v2721_v21 }
0x14d5   :  { %v4194_v46 = vpop.eup %4193 }
0x14d6   :  { %v2724_v63 = vsel %vm201_vm2, %v4194_v46, 0.0  ;;  %v2962_v34 = vpop.permute.xlu1 %2961 }
0x14d7   :  { %2725 = vadd.xlane.f32.xlu0 %v2724_v63 }
0x14ed   :  { %2883 = vrot.lane.b32.xlu0 %v4669_v44, %s4299_s1 }
0x1560   :  { %v2723_v22 = vpop.xlane.xlu0 %2722 }
0x1561   :  { %4195 = vrcp.f32 %v2723_v22 }
0x1564   :  { %v2726_v24 = vpop.xlane.xlu0 %2725 }
0x1565   :  { %4197 = vrcp.f32 %v2726_v24 }
0x1568   :  { %v2884_v44 = vpop.permute.xlu0 %2883 }
0x156b   :  { %v4196_v28 = vpop.eup %4195 }
0x156c   :  { %v2729_v29 = vmul.f32 %v4196_v28, %v4192_v20 }
0x156e   :  { %3952 = vmatmul.mubr.msk.f32.vlgmr.msra.gmra.mrb[26].mxu0 %vm201_vm2, %v2729_v29 }
0x156f   :  { %v4198_v31 = vpop.eup %4197  ;;  %3960 = vmatpush3.xpose.msk.msra.mxu0 %vm201_vm2, %v2886_v26  ;;  %3961 = vmatprep.mubr.msk.f32.mxu0 %vm4289_vm1, %v4288_v42 }
0x1570   :  { %v2730_v33 = vmul.f32 %v4198_v31, %v4194_v46  ;;  %3969 = vmatprep.subr.mxu0 %v4288_v42 }
0x1572   :  { %3957 = vmatmul.mubr.msk.f32.vlgmr.msra.gmra.mrb[34].mxu1 %vm201_vm2, %v2730_v33  ;;  %3962 = vmatmul.mubr.msk.f32.vlgmr.msra.gmra.mrb[28].mxu0 %vm201_vm2, %v2884_v44 }
0x1573   :  { %3965 = vmatpush3.xpose.msk.msra.mxu1 %vm201_vm2, %v2964_v32  ;;  %3966 = vmatprep.mubr.msk.f32.mxu1 %vm4289_vm1, %v4288_v42 }
0x1574   :  { %3974 = vmatprep.subr.mxu1 %v4288_v42  ;;  %3971 = vmatprep.mubr.msk.f32.mxu0 %vm4289_vm1, %v4288_v42 }
0x1576   :  { %3967 = vmatmul.mubr.msk.f32.vlgmr.msra.gmra.mrb[36].mxu1 %vm201_vm2, %v2962_v34 }
0x1577   :  { %3976 = vmatprep.mubr.msk.f32.mxu1 %vm4289_vm1, %v4288_v42 }
0x1641   :  { %v2803_v35 = vpop.f32.mrb[26].mxu0 }
0x1642   :  { %v3953_v36 = vpop.f32.mrb[27].mxu0 }
0x1645   :  { %v2879_v37 = vpop.f32.mrb[34].mxu1  ;;  %v2957_v38 = vpop.f32.mrb[28].mxu0 }
0x1646   :  { %v3039_v39 = vmul.f32 0.17677669, %v2957_v38  ;;  %v3958_v43 = vpop.f32.mrb[35].mxu1  ;;  %v3963_v30 = vpop.f32.mrb[29].mxu0 }
0x1648   :  { %v3041_v41 = vsel %vm201_vm2, %v3039_v39, -inf }
0x1649   :  { %3042 = vmax.xlane.f32.xlu0 %v3041_v41  ;;  %v3035_v48 = vpop.f32.mrb[36].mxu1 }
0x164a   :  { %v3040_v49 = vmul.f32 0.17677669, %v3035_v48  ;;  %v3968_v25 = vpop.f32.mrb[37].mxu1 }
0x164b   :  { %v3381_v25 = vld [vmem:[%s4918_s5] sm:$0xff] }
0x164c   :  { %v3044_v52 = vsel %vm201_vm2, %v3040_v49, -inf }
0x164d   :  { %3045 = vmax.xlane.f32.xlu1 %v3044_v52  ;;  %v3382_v52 = vld [vmem:[%s4918_s5 + $0x8] sm:$0xff] }
0x165e   :  { %3139 = vrot.lane.b32.xlu1 %v4671_v23, %s4298_s10 }
0x1662   :  { %4126 = vrot.lane.b32.xlu1 %v4624_v54, %s4301_s14 }
0x1666   :  { %4131 = vrot.lane.b32.xlu1 %v4638_v5, %s4301_s14 }
0x166a   :  { %3219 = vrot.lane.b32.xlu1 %v4761_v61, %s4286_s20 }
0x166e   :  { %3227 = vrot.lane.b32.xlu1 %v2879_v37, %s4302_s15 }
0x16d6   :  { %v3043_v42 = vpop.xlane.xlu0 %3042 }
0x16d7   :  { %v3047_v53 = vsub.f32 %v3039_v39, %v3043_v42  ;;  %v4060_v42 = vpack.c.bf16 %v3382_v52, %v3381_v25 }
0x16d9   :  { %v3049_v1 = vmul.f32 1.442695, %v3047_v53  ;;  %v3383_v53 = vld [vmem:[%s4918_s5 + $0x10] sm:$0xff] }
0x16da   :  { %v3046_v0 = vpop.xlane.xlu1 %3045 }
0x16db   :  { %4199 = vpow2.f32 %v3049_v1  ;;  %v3048_v55 = vsub.f32 %v3040_v49, %v3046_v0  ;;  %v3384_v1 = vld [vmem:[%s4918_s5 + $0x18] sm:$0xff] }
0x16dc   :  { %v4064_v0 = vpack.c.bf16 %v3384_v1, %v3383_v53 }
0x16dd   :  { %v3051_v56 = vmul.f32 1.442695, %v3048_v55  ;;  %v3475_v55 = vld [vmem:[%s4920_s7] sm:$0xff] }
0x16de   :  { %v3140_v57 = vpop.permute.xlu1 %3139 }
0x16df   :  { %4201 = vpow2.f32 %v3051_v56  ;;  %3975 = vmatpush3.msra.mxu1 %v3140_v57  ;;  %v3476_v56 = vld [vmem:[%s4920_s7 + $0x8] sm:$0xff]  ;;  %v3477_v57 = vld [vmem:[%s4920_s7 + $0x10] sm:$0xff] }
0x16e0   :  { %4061 = vmatprep.subr.bf16.mxu1 %v4060_v42 }
0x16e2   :  { %v4127_v61 = vpop.permute.xlu1 %4126 }
0x16e3   :  { %v4129_v62 = vunpack.i.h.bf16 %v4127_v61  ;;  %v4128_v45 = vunpack.i.l.bf16 %v4127_v61 }
0x16e5   :  { %v4200_v23 = vpop.eup %4199  ;;  %v4052_v4 = vpack.c.bf16 %v4129_v62, %v4128_v45 }
0x16e6   :  { %v3053_v54 = vsel %vm201_vm2, %v4200_v23, 0.0  ;;  %v4132_v14 = vpop.permute.xlu1 %4131 }
0x16e7   :  { %3054 = vadd.xlane.f32.xlu0 %v3053_v54  ;;  %v4134_v15 = vunpack.i.h.bf16 %v4132_v14  ;;  %v4133_v16 = vunpack.i.l.bf16 %v4132_v14  ;;  %v3478_v54 = vld [vmem:[%s4920_s7 + $0x18] sm:$0xff] }
0x16e9   :  { %v4202_v5 = vpop.eup %4201  ;;  %v4056_v19 = vpack.c.bf16 %v4134_v15, %v4133_v16  ;;  %v3371_v16 = vsub.s32 4, %v4423_v27 }
0x16ea   :  { %v3056_v58 = vsel %vm201_vm2, %v4202_v5, 0.0  ;;  %v3220_v18 = vpop.permute.xlu1 %3219 }
0x16eb   :  { %3057 = vadd.xlane.f32.xlu0 %v3056_v58  ;;  %v3240_v26 = vsel %vm201_vm2, %v4723_v47, %v3220_v18  ;;  %v3479_v58 = vld [vmem:[%s4920_s7 + $0x20] sm:$0xff] }
0x16ee   :  { %v3228_v46 = vpop.permute.xlu1 %3227 }
0x16ef   :  { %v3242_v28 = vsel %vm1551_vm4, %v3240_v26, %v3228_v46  ;;  %v3659_v46 = vld [vmem:[%s4919_s6] ss:$0 sm:$0xff] }
0x1701   :  { %3063 = vrot.lane.b32.xlu0 %v4663_v40, %s4298_s10 }
0x1705   :  { %3217 = vrot.lane.b32.xlu0 %v4759_v59, %s4286_s20 }
0x1709   :  { %3225 = vrot.lane.b32.xlu0 %v2803_v35, %s4302_s15 }
0x1774   :  { %v3055_v60 = vpop.xlane.xlu0 %3054 }
0x1775   :  { %4203 = vrcp.f32 %v3055_v60  ;;  %v3480_v60 = vld [vmem:[%s4920_s7 + $0x28] sm:$0xff] }
0x1776   :  { %v4076_v61 = vpack.c.bf16 %v3480_v60, %v3479_v58 }
0x1778   :  { %v3058_v2 = vpop.xlane.xlu0 %3057 }
0x1779   :  { %4205 = vrcp.f32 %v3058_v2 }
0x177c   :  { %v3064_v17 = vpop.permute.xlu0 %3063 }
0x177d   :  { %3970 = vmatpush3.msra.mxu0 %v3064_v17  ;;  %v3377_v17 = vsub.s32 5, %v4423_v27  ;;  %v3481_v27 = vld [vmem:[%s4920_s7 + $0x30] sm:$0xff] }
0x177e   :  { %4053 = vmatprep.subr.bf16.mxu0 %v4052_v4 }
0x177f   :  { %v4204_v40 = vpop.eup %4203 }
0x1780   :  { %v3061_v3 = vmul.f32 %v4204_v40, %v4200_v23  ;;  %v3218_v12 = vpop.permute.xlu0 %3217  ;;  %v4068_v23 = vpack.c.bf16 %v3476_v56, %v3475_v55  ;;  %v4211_v40 = vld [vmem:[%s4915_s2] sm:$0x3f] }
0x1781   :  { %v3239_v21 = vsel %vm201_vm2, %v4721_v13, %v3218_v12 }
0x1782   :  { %3972 = vmatmul.mubr.msk.f32.vlgmr.msra.gmra.mrb[30].mxu0 %vm201_vm2, %v3061_v3 }
0x1783   :  { %v4206_v59 = vpop.eup %4205  ;;  %4055 = vmatpush3.bf16.msra.mxu0 %v4052_v4 }
0x1784   :  { %v3062_v6 = vmul.f32 %v4206_v59, %v4202_v5  ;;  %4057 = vmatprep.subr.bf16.mxu0 %v4056_v19  ;;  %v3226_v20 = vpop.permute.xlu0 %3225  ;;  %v4072_v5 = vpack.c.bf16 %v3478_v54, %v3477_v57 }
0x1785   :  { %v3241_v63 = vsel %vm1551_vm4, %v3239_v21, %v3226_v20  ;;  %v3482_v20 = vld [vmem:[%s4920_s7 + $0x38] sm:$0xff]  ;;  %s4304_s7 = smov [#allocation7]  }
0x1786   :  { %3977 = vmatmul.mubr.msk.f32.vlgmr.msra.gmra.mrb[38].mxu1 %vm201_vm2, %v3062_v6  ;;  %v3378_v6 = vrot.slane %v4211_v40, %v3377_v17  ;;  %v4080_v21 = vpack.c.bf16 %v3482_v20, %v3481_v27  ;;  %s3581_s12 = sshll.u32 %s4304_s7, 4  ;;  %s3582_s12 = int_to_ptr.vmem [resolvable:$true] %s3581_s12 }
0x1787   :  { %4059 = vmatpush3.bf16.msra.mxu0 %v4056_v19  ;;  %4063 = vmatpush3.bf16.msra.mxu1 %v4060_v42  ;;  %v3372_v19 = vrot.slane %v4211_v40, %v3371_v16  ;;  %s4256_s6 = scalar_lea.vmem %s3582_s12, 256  ;;  %p4261_p3 = scmp.lt.s32.totalorder %s3582_s12, %s3582_s12 }
0x1788   :  { %4065 = vmatprep.subr.bf16.mxu1 %v4064_v0  ;;  %4069 = vmatprep.subr.bf16.mxu0 %v4068_v23  ;;  %p4257_p2 = scmp.ne.s32.totalorder %s3582_s12, %s4256_s6  ;;  %p4262_p4 = scmp.lt.s32.totalorder %s4256_s6, %s4256_s6 }
0x178a   :  { %p4263_p5 = por %p4262_p4, %p4261_p3 }
0x178b   :  { %4067 = vmatpush3.bf16.msra.mxu1 %v4064_v0 }
0x178c   :  { %p4264_p6 = pnand %p4263_p5, %p4257_p2 }
0x1855   :  { %v3135_v8 = vpop.f32.mrb[30].mxu0 }
0x1856   :  { %3233 = vrot.lane.b32.xlu0 %v3135_v8, %s4303_s16  ;;  %v3973_v9 = vpop.f32.mrb[31].mxu0 }
0x1859   :  { %v3211_v10 = vpop.f32.mrb[38].mxu1 }
0x185a   :  { %3235 = vrot.lane.b32.xlu1 %v3211_v10, %s4303_s16  ;;  %v3978_v11 = vpop.f32.mrb[39].mxu1  ;;  %3257 = vrot.lane.b32.xlu0 %v4647_v7, %s4301_s14 }
0x18c8   :  { %v3234_v22 = vpop.permute.xlu0 %3233 }
0x18c9   :  { %v3243_v24 = vsel %vm1554_vm3, %v3241_v63, %v3234_v22 }
0x18ca   :  { %3987 = vmatprep.mubr.msk.f32.mxu0 %vm66_vm0, %v3243_v24 }
0x18cc   :  { %v3236_v7 = vpop.permute.xlu1 %3235  ;;  %v3258_v31 = vpop.permute.xlu0 %3257 }
0x18cd   :  { %v3244_v29 = vsel %vm1554_vm3, %v3242_v28, %v3236_v7 }
0x18ce   :  { %3988 = vmatmul.mubr.msk.f32.vlgmr.msra.gmra.mrb[32].mxu0 %vm66_vm0, %v3244_v29  ;;  %v3662_v29 = vld [vmem:[%s4921_s8] ss:$0 sm:$0xff] }
0x18cf   :  { %4071 = vmatpush3.bf16.msra.mxu0 %v4068_v23 }
0x18d0   :  { %4073 = vmatprep.subr.bf16.mxu0 %v4072_v5 }
0x18d3   :  { %4075 = vmatpush3.bf16.msra.mxu0 %v4072_v5 }
0x18d4   :  { %4077 = vmatprep.subr.bf16.mxu0 %v4076_v61 }
0x18d7   :  { %4079 = vmatpush3.bf16.msra.mxu0 %v4076_v61 }
0x18d8   :  { %4081 = vmatprep.subr.bf16.mxu0 %v4080_v21 }
0x18db   :  { %4083 = vmatpush3.bf16.msra.mxu0 %v4080_v21 }
0x19a1   :  { %v3989_v13 = vpop.f32.mrb[32].mxu0 }
0x19a2   :  { %v3338_v32 = vadd.f32 %v3989_v13, %v3258_v31  ;;  %v3332_v33 = vpop.f32.mrb[33].mxu0 }
0x19a3   :  { %v3333_v44 = vadd.f32 %v3332_v33, %v3258_v31 }
0x19a4   :  { %v4832_v34 = vadd.f32 %v3338_v32, %v4609_v50 }
0x19a5   :  { %v4835_v35 = vadd.f32 %v3333_v44, %v4612_v51 }
0x19a6   :  { %v3346_v47 = vsel %vm66_vm0, %v4832_v34, 0.0 }
0x19a7   :  { %3347 = vadd.xlane.f32.xlu0 %v3346_v47  ;;  %v3343_v36 = vsel %vm66_vm0, %v4835_v35, 0.0 }
0x19a8   :  { %3344 = vadd.xlane.f32.xlu1 %v3343_v36 }
0x1a34   :  { %v3348_v37 = vpop.xlane.xlu0 %3347 }
0x1a35   :  { %v3350_v38 = vmul.f32 0.03125, %v3348_v37  ;;  %v3345_v39 = vpop.xlane.xlu1 %3344 }
0x1a36   :  { %v3349_v43 = vmul.f32 0.03125, %v3345_v39 }
0x1a37   :  { %v3352_v30 = vsub.f32 %v4832_v34, %v3350_v38 }
0x1a38   :  { %v3351_v50 = vsub.f32 %v4835_v35, %v3349_v43 }
0x1a39   :  { %v3354_v48 = vmul.f32 %v3352_v30, %v3352_v30 }
0x1a3a   :  { %v3353_v41 = vmul.f32 %v3351_v50, %v3351_v50 }
0x1a3b   :  { %v3358_v49 = vsel %vm66_vm0, %v3354_v48, 0.0 }
0x1a3c   :  { %v3355_v51 = vsel %vm66_vm0, %v3353_v41, 0.0 }
0x1a3d   :  { %3356 = vadd.xlane.f32.xlu0 %v3355_v51 }
0x1a41   :  { %3359 = vadd.xlane.f32.xlu0 %v3358_v49 }
0x1aca   :  { %v3357_v62 = vpop.xlane.xlu0 %3356 }
0x1acb   :  { %v3361_v45 = vmul.f32 0.03125, %v3357_v62 }
0x1acd   :  { %v3363_v2 = vadd.f32 1e-06, %v3361_v45 }
0x1ace   :  { %v3360_v4 = vpop.xlane.xlu0 %3359 }
0x1acf   :  { %4207 = vrsqrt.f32 %v3363_v2  ;;  %v3362_v14 = vmul.f32 0.03125, %v3360_v4 }
0x1ad1   :  { %v3364_v15 = vadd.f32 1e-06, %v3362_v14 }
0x1ad3   :  { %4209 = vrsqrt.f32 %v3364_v15 }
0x1ad9   :  { %v4208_v3 = vpop.eup %4207 }
0x1ada   :  { %v3367_v59 = vmul.f32 %v4208_v3, %v3351_v50 }
0x1adc   :  { %v3373_v8 = vmul.f32 %v3372_v19, %v3367_v59 }
0x1add   :  { %v4210_v9 = vpop.eup %4209 }
0x1ade   :  { %v3368_v10 = vmul.f32 %v4210_v9, %v3352_v30  ;;  %v3379_v11 = vadd.f32 %v3378_v6, %v3373_v8 }
0x1ae0   :  { %v3374_v12 = vmul.f32 %v3372_v19, %v3368_v10  ;;  %3998 = vmatprep.mubr.msk.f32.mxu1 %vm66_vm0, %v3379_v11 }
0x1ae2   :  { %v3380_v18 = vadd.f32 %v3378_v6, %v3374_v12 }
0x1ae4   :  { %3999 = vmatmul.mubr.msk.f32.vlgmr.msra.gmra.mrb[40].mxu1 %vm66_vm0, %v3380_v18 }
0x1bb7   :  { %v4000_v63 = vpop.f32.mrb[40].mxu1 }
0x1bb8   :  { %v3470_v22 = vadd.f32 %v4000_v63, %v3659_v46  ;;  %v3464_v24 = vpop.f32.mrb[41].mxu1 }
0x1bb9   :  { %v3465_v26 = vadd.f32 %v3659_v46, %v3464_v24 }
0x1bba   :  { %v3474_v7 = vmax.f32 %v3470_v22, 0.0 }
0x1bbb   :  { %v3473_v28 = vmax.f32 %v3465_v26, 0.0 }
0x1bbd   :  { %4017 = vmatprep.mubr.msk.f32.mxu0 %vm3490_vm5, %v3473_v28 }
0x1bbe   :  { %4018 = vmatmul.mubr.msk.f32.vlgmr.msra.gmra.mrb[34].mxu0 %vm3490_vm5, %v3474_v7 }
0x1c91   :  { %v4019_v31 = vpop.f32.mrb[34].mxu0 }
0x1c92   :  { %v3569_v13 = vadd.f32 %v4019_v31, %v3662_v29  ;;  %v3563_v32 = vpop.f32.mrb[35].mxu0 }
0x1c93   :  { %v3564_v33 = vadd.f32 %v3662_v29, %v3563_v32 }
0x1c94   :  { %v3573_v44 = vadd.f32 %v3569_v13, %v4832_v34 }
0x1c95   :  { %v3572_v47 = vadd.f32 %v3564_v33, %v4835_v35 }
0x1c96   :  { %3575 = vst.msk [vmem:[#allocation7 + $0x8] sm:$0xff] %vm66_vm0, %v3573_v44 }
0x1c97   :  { %3574 = vst.msk [vmem:[#allocation7] sm:$0xff] %vm66_vm0, %v3572_v47 }
0x1c98   :  { %4267 = shalt.err (!%p4264_p6)
}
0x1c99   :  { %s4268_s10 = scalar_lea.hbm %s4922_s9, 256 }
0x1c9a   :  { %p4269_p7 = scmp.ne.s32.totalorder %s4922_s9, %s4268_s10  ;;  %p4272_p8 = scmp.lt.u32.totalorder %s4268_s10, %s4922_s9 }
0x1c9c   :  { %p4274_p9 = pnand %p4272_p8, %p4269_p7 }
0x1c9e   :  { %4277 = shalt.err (!%p4274_p9)
}
0x1c9f   :  { %3587 = dma.vmem_to_hbm [thread:$0]  %s3582_s12, 256, %s4922_s9, [#allocation4], %s4285_s19, %s4285_s19, %s4286_s20  }
0x1ca0   :  { %4282 = dma.done.wait [#allocation4], 256  }
0x1ca1   :  { %4283 = vsyncadd [#allocation4], 4294967040 }
0x1ca2   :  { %3591 = vsyncpa [#allocation3], 1 }
0x1ca3   :  { %3592 = vsyncpa [#allocation6], 1 }
0x1ca4   :  { %3593 = vsyncpa [#allocation4], 1 }

</bundles_post_ra>
